<compile_context>
chip_gen: v7x
topology: tpu7x:2x2x1
jax: 0.10.0
libtpu: 0.0.40
codegen_flags: <defaults>
</compile_context>

<pallas_src>
import jax
import jax.numpy as jnp
from jax.experimental import pallas as pl
from jax.experimental.pallas import tpu as pltpu

EMBED_DIM = 128      # small stand-in for the module's default embed_dim=768
GATE_HIDDEN = 512    # fixed by the module
GATE_OUT = 2         # fixed by the module
MLP_HIDDEN = 256     # fixed by the module
MLP_OUT = 4          # fixed by the module
MLP_OUT_PAD = 128    # lane-dense padded output width (zero-padded weight columns)
LN_EPS = 1e-5        # nn.LayerNorm default eps


def fusion_kernel(v1_ref, v2_ref,
                  gw1_ref, gb1_ref, wdiff_ref, bdiff_ref,
                  ln_g_ref, ln_b_ref,
                  mw1_ref, mb1_ref, mw2_ref, mb2_ref,
                  out_ref):
    v1 = v1_ref[...]                       # f32 [tb, E]
    v2 = v2_ref[...]                       # f32 [tb, E]

    # ---- gate MLP: Linear(2E, 512) on concat([v1, v2], -1), ReLU --------------
    # Single K=2E bf16 matmul (full MXU depth on v6e/v7x); f32 accumulation.
    vcat = jnp.concatenate([v1.astype(jnp.bfloat16), v2.astype(jnp.bfloat16)],
                           axis=-1)        # bf16 [tb, 2E]
    h = jnp.dot(vcat, gw1_ref[...], preferred_element_type=jnp.float32) + gb1_ref[...]
    h = jnp.maximum(h, 0.0)                # f32 [tb, 512]

    # ---- gate head: softmax over 2 logits == sigmoid(logit0 - logit1) ---------
    # wdiff = W2[:,0]-W2[:,1], bdiff = b2[0]-b2[1] precomputed in the wrapper.
    d = jnp.sum(h * wdiff_ref[...], axis=-1, keepdims=True) + bdiff_ref[...]
    w1 = 1.0 / (1.0 + jnp.exp(-d))         # exp runs on the (otherwise idle) EUP
    w2 = 1.0 - w1

    # ---- gated fusion (f32) ----------------------------------------------------
    vf = w1 * v1 + w2 * v2

    # ---- LayerNorm(E): biased variance, eps=1e-5 (matches nn.LayerNorm) --------
    mean = jnp.mean(vf, axis=-1, keepdims=True)
    cen = vf - mean
    var = jnp.mean(cen * cen, axis=-1, keepdims=True)
    vf = cen * jax.lax.rsqrt(var + LN_EPS) * ln_g_ref[...] + ln_b_ref[...]

    # TODO(synk): dropout (p=0.3) is identity in eval mode; training-mode dropout not implemented.

    # ---- head MLP: Linear(E, 256), ReLU, Linear(256, 4->padded 128) ------------
    h2 = jnp.dot(vf.astype(jnp.bfloat16), mw1_ref[...],
                 preferred_element_type=jnp.float32) + mb1_ref[...]
    h2 = jnp.maximum(h2, 0.0)
    out = jnp.dot(h2.astype(jnp.bfloat16), mw2_ref[...],
                  preferred_element_type=jnp.float32) + mb2_ref[...]
    out_ref[...] = out.astype(out_ref.dtype)   # lane-dense (tb, 128) store


def final_fusion_mlp(v1, v2, params, *, tb=128):
    """params = prepare_params(raw); returns [B, 4] f32."""
    B, E = v1.shape
    n_blocks = pl.cdiv(B, tb)
    Bp = n_blocks * tb
    if Bp != B:
        pad = Bp - B
        v1 = jnp.pad(v1, ((0, pad), (0, 0)))
        v2 = jnp.pad(v2, ((0, pad), (0, 0)))

    bmap = lambda i: (i, 0)     # batch-tiled operands
    fixed = lambda i: (0, 0)    # weights: same block every grid step

    in_specs = [
        pl.BlockSpec((tb, E), bmap),                        # v1
        pl.BlockSpec((tb, E), bmap),                        # v2
        pl.BlockSpec((2 * E, GATE_HIDDEN), fixed),          # gate W1 (bf16, fused [2E,512])
        pl.BlockSpec((1, GATE_HIDDEN), fixed),              # gate b1
        pl.BlockSpec((1, GATE_HIDDEN), fixed),              # wdiff = W2[:,0]-W2[:,1]
        pl.BlockSpec((1, 1), fixed),                        # bdiff = b2[0]-b2[1]
        pl.BlockSpec((1, E), fixed),                        # LN gamma
        pl.BlockSpec((1, E), fixed),                        # LN beta
        pl.BlockSpec((E, MLP_HIDDEN), fixed),               # mlp W1 (bf16)
        pl.BlockSpec((1, MLP_HIDDEN), fixed),               # mlp b1
        pl.BlockSpec((MLP_HIDDEN, MLP_OUT_PAD), fixed),     # mlp W2 (bf16, zero-padded to 128)
        pl.BlockSpec((1, MLP_OUT_PAD), fixed),              # mlp b2 (zero-padded to 128)
    ]
    out_spec = pl.BlockSpec((tb, MLP_OUT_PAD), bmap)

    # Advisory cost estimate (helps XLA scheduling when embedded in a larger graph).
    flops_per_row = (2 * (2 * E) * GATE_HIDDEN          # gate layer 1
                     + 2 * GATE_HIDDEN                   # gate logit-diff reduce
                     + 2 * E * MLP_HIDDEN                # mlp layer 1
                     + 2 * MLP_HIDDEN * MLP_OUT_PAD      # mlp layer 2 (padded)
                     + 12 * E)                           # fusion + LayerNorm elementwise
    param_bytes = sum(int(p.size) * p.dtype.itemsize for p in params)
    cost = pl.CostEstimate(
        flops=int(Bp * flops_per_row),
        transcendentals=int(2 * Bp),                     # exp + rsqrt per row
        bytes_accessed=int(2 * Bp * E * 4 + param_bytes + Bp * MLP_OUT_PAD * 4),
    )

    out = pl.pallas_call(
        fusion_kernel,
        out_shape=jax.ShapeDtypeStruct((Bp, MLP_OUT_PAD), jnp.float32),
        grid=(n_blocks,),
        in_specs=in_specs,
        out_specs=out_spec,
        compiler_params=pltpu.CompilerParams(dimension_semantics=("parallel",)),
        cost_estimate=cost,
    )(v1, v2, *params)

    return out[:B, :MLP_OUT]


# ------------------------- parameter handling --------------------------------

def init_raw_params(key, E):
    """f32 parameters in the original nn.Module layout."""
    ks = jax.random.split(key, 8)
    s = 0.05
    gw1 = s * jax.random.normal(ks[0], (2 * E, GATE_HIDDEN), jnp.float32)
    gb1 = s * jax.random.normal(ks[1], (1, GATE_HIDDEN), jnp.float32)
    gw2 = s * jax.random.normal(ks[2], (GATE_HIDDEN, GATE_OUT), jnp.float32)
    gb2 = s * jax.random.normal(ks[3], (1, GATE_OUT), jnp.float32)
    ln_g = jnp.ones((1, E), jnp.float32)
    ln_b = jnp.zeros((1, E), jnp.float32)
    mw1 = s * jax.random.normal(ks[4], (E, MLP_HIDDEN), jnp.float32)
    mb1 = s * jax.random.normal(ks[5], (1, MLP_HIDDEN), jnp.float32)
    mw2 = s * jax.random.normal(ks[6], (MLP_HIDDEN, MLP_OUT), jnp.float32)
    mb2 = s * jax.random.normal(ks[7], (1, MLP_OUT), jnp.float32)
    return (gw1, gb1, gw2, gb2, ln_g, ln_b, mw1, mb1, mw2, mb2)


def prepare_params(raw):
    """Convert module params to kernel params: bf16 matmul weights, sigmoid gate
    reformulation (wdiff/bdiff), and zero-padded lane-dense final layer."""
    gw1, gb1, gw2, gb2, ln_g, ln_b, mw1, mb1, mw2, mb2 = raw
    wdiff = (gw2[:, 0] - gw2[:, 1]).reshape(1, GATE_HIDDEN)
    bdiff = (gb2[:, 0] - gb2[:, 1]).reshape(1, 1)
    mw2p = jnp.zeros((MLP_HIDDEN, MLP_OUT_PAD), jnp.bfloat16)
    mw2p = mw2p.at[:, :MLP_OUT].set(mw2.astype(jnp.bfloat16))
    mb2p = jnp.zeros((1, MLP_OUT_PAD), jnp.float32)
    mb2p = mb2p.at[:, :MLP_OUT].set(mb2)
    return (gw1.astype(jnp.bfloat16), gb1, wdiff, bdiff,
            ln_g, ln_b,
            mw1.astype(jnp.bfloat16), mb1, mw2p, mb2p)


def reference(v1, v2, raw):
    """Pure-JAX reference matching the PyTorch forward (eval mode), mirroring the
    bf16 rounding applied to matmul operands in the kernel."""
    gw1, gb1, gw2, gb2, ln_g, ln_b, mw1, mb1, mw2, mb2 = raw
    b16 = lambda x: x.astype(jnp.bfloat16)
    cat = jnp.concatenate([v1, v2], axis=-1)
    h = jnp.maximum(jnp.dot(b16(cat), b16(gw1),
                            preferred_element_type=jnp.float32) + gb1, 0.0)
    gates = jax.nn.softmax(h @ gw2 + gb2, axis=-1)
    vf = gates[:, 0:1] * v1 + gates[:, 1:2] * v2
    mean = vf.mean(-1, keepdims=True)
    var = ((vf - mean) ** 2).mean(-1, keepdims=True)
    vf = (vf - mean) * jax.lax.rsqrt(var + LN_EPS) * ln_g + ln_b
    h2 = jnp.maximum(jnp.dot(b16(vf), b16(mw1),
                             preferred_element_type=jnp.float32) + mb1, 0.0)
    return jnp.dot(b16(h2), b16(mw2), preferred_element_type=jnp.float32) + mb2


if __name__ == "__main__":
    key = jax.random.PRNGKey(0)
    kp, k1, k2 = jax.random.split(key, 3)
    B, E = 200, EMBED_DIM                     # B not a multiple of tb -> exercises tail padding
    v1 = jax.random.normal(k1, (B, E), jnp.float32)
    v2 = jax.random.normal(k2, (B, E), jnp.float32)
    raw = init_raw_params(kp, E)
    params = prepare_params(raw)

    out = final_fusion_mlp(v1, v2, params, tb=128)
    out = jax.block_until_ready(out)

    ref = reference(v1, v2, raw)
    assert out.shape == (B, MLP_OUT)
    max_err = jnp.max(jnp.abs(out - ref))
    assert jnp.allclose(out, ref, rtol=1e-2, atol=1e-2), (
        f"mismatch: max abs err {max_err}")
    print("KERNEL_OK")
</pallas_src>

<mosaic_0001>
module attributes {stable_mosaic.version = 11 : i64} {
  func.func @fusion_kernel(%arg0: i32, %arg1: memref<128x128xf32, #tpu.memory_space<vmem>>, %arg2: memref<128x128xf32, #tpu.memory_space<vmem>>, %arg3: memref<256x512xbf16, #tpu.memory_space<vmem>>, %arg4: memref<1x512xf32, #tpu.memory_space<vmem>>, %arg5: memref<1x512xf32, #tpu.memory_space<vmem>>, %arg6: memref<1x1xf32, #tpu.memory_space<vmem>>, %arg7: memref<1x128xf32, #tpu.memory_space<vmem>>, %arg8: memref<1x128xf32, #tpu.memory_space<vmem>>, %arg9: memref<128x256xbf16, #tpu.memory_space<vmem>>, %arg10: memref<1x256xf32, #tpu.memory_space<vmem>>, %arg11: memref<256x128xbf16, #tpu.memory_space<vmem>>, %arg12: memref<1x128xf32, #tpu.memory_space<vmem>>, %arg13: memref<128x128xf32, #tpu.memory_space<vmem>>) attributes {dimension_semantics = [#tpu.dimension_semantics<parallel>], iteration_bounds = array<i64: 2>, scalar_prefetch = 0 : i64, scratch_operands = 0 : i64, tpu.core_type = #tpu.core_type<tc>, window_params = [{transform_indices = @transform_0, window_bounds = array<i64: 128, 128>}, {transform_indices = @transform_1, window_bounds = array<i64: 128, 128>}, {pipeline_mode = #tpu.pipeline_mode<synchronous>, transform_indices = @transform_2, window_bounds = array<i64: 256, 512>}, {pipeline_mode = #tpu.pipeline_mode<synchronous>, transform_indices = @transform_3, window_bounds = array<i64: 1, 512>}, {pipeline_mode = #tpu.pipeline_mode<synchronous>, transform_indices = @transform_4, window_bounds = array<i64: 1, 512>}, {pipeline_mode = #tpu.pipeline_mode<synchronous>, transform_indices = @transform_5, window_bounds = array<i64: 1, 1>}, {pipeline_mode = #tpu.pipeline_mode<synchronous>, transform_indices = @transform_6, window_bounds = array<i64: 1, 128>}, {pipeline_mode = #tpu.pipeline_mode<synchronous>, transform_indices = @transform_7, window_bounds = array<i64: 1, 128>}, {pipeline_mode = #tpu.pipeline_mode<synchronous>, transform_indices = @transform_8, window_bounds = array<i64: 128, 256>}, {pipeline_mode = #tpu.pipeline_mode<synchronous>, transform_indices = @transform_9, window_bounds = array<i64: 1, 256>}, {pipeline_mode = #tpu.pipeline_mode<synchronous>, transform_indices = @transform_10, window_bounds = array<i64: 256, 128>}, {pipeline_mode = #tpu.pipeline_mode<synchronous>, transform_indices = @transform_11, window_bounds = array<i64: 1, 128>}, {transform_indices = @transform_12, window_bounds = array<i64: 128, 128>}]} {
    %c0 = arith.constant 0 : index
    %c0_0 = arith.constant 0 : index
    %0 = vector.load %arg1[%c0, %c0_0] : memref<128x128xf32, #tpu.memory_space<vmem>>, vector<128x128xf32>
    %c0_1 = arith.constant 0 : index
    %c0_2 = arith.constant 0 : index
    %1 = vector.load %arg2[%c0_1, %c0_2] : memref<128x128xf32, #tpu.memory_space<vmem>>, vector<128x128xf32>
    %2 = arith.truncf %0 : vector<128x128xf32> to vector<128x128xbf16>
    %3 = arith.truncf %1 : vector<128x128xf32> to vector<128x128xbf16>
    %4 = tpu.concatenate %2, %3 in 1 : vector<128x128xbf16>, vector<128x128xbf16> -> vector<128x256xbf16>
    %c0_3 = arith.constant 0 : index
    %c0_4 = arith.constant 0 : index
    %5 = vector.load %arg3[%c0_3, %c0_4] : memref<256x512xbf16, #tpu.memory_space<vmem>>, vector<256x512xbf16>
    %cst = arith.constant dense<0.000000e+00> : vector<128x512xf32>
    %6 = tpu.matmul %4, %5, %cst {dimension_numbers = #tpu.dot_dimension_numbers<[1], [0], [0], [1], [0, 0, 1, 1], [], []>} : vector<128x256xbf16>, vector<256x512xbf16>, vector<128x512xf32> -> vector<128x512xf32>
    %c0_5 = arith.constant 0 : index
    %c0_6 = arith.constant 0 : index
    %7 = vector.load %arg4[%c0_5, %c0_6] : memref<1x512xf32, #tpu.memory_space<vmem>>, vector<1x512xf32>
    %8 = vector.broadcast %7 : vector<1x512xf32> to vector<128x512xf32>
    %9 = arith.addf %6, %8 : vector<128x512xf32>
    %cst_7 = arith.constant 0.000000e+00 : f32
    %10 = vector.broadcast %cst_7 : f32 to vector<128x512xf32>
    %11 = arith.maximumf %9, %10 : vector<128x512xf32>
    %c0_8 = arith.constant 0 : index
    %c0_9 = arith.constant 0 : index
    %12 = vector.load %arg5[%c0_8, %c0_9] : memref<1x512xf32, #tpu.memory_space<vmem>>, vector<1x512xf32>
    %13 = vector.broadcast %12 : vector<1x512xf32> to vector<128x512xf32>
    %14 = arith.mulf %11, %13 : vector<128x512xf32>
    %cst_10 = arith.constant dense<0.000000e+00> : vector<128xf32>
    %15 = vector.multi_reduction <add>, %14, %cst_10 [1] : vector<128x512xf32> to vector<128xf32>
    %16 = vector.shape_cast %15 : vector<128xf32> to vector<128x1xf32>
    %c0_11 = arith.constant 0 : index
    %c0_12 = arith.constant 0 : index
    %17 = vector.load %arg6[%c0_11, %c0_12] : memref<1x1xf32, #tpu.memory_space<vmem>>, vector<1x1xf32>
    %18 = vector.broadcast %17 : vector<1x1xf32> to vector<128x1xf32>
    %19 = arith.addf %16, %18 : vector<128x1xf32>
    %cst_13 = arith.constant 0.000000e+00 : f32
    %20 = vector.broadcast %cst_13 : f32 to vector<128x1xf32>
    %21 = arith.subf %20, %19 : vector<128x1xf32>
    %22 = math.exp %21 : vector<128x1xf32>
    %cst_14 = arith.constant 1.000000e+00 : f32
    %23 = vector.broadcast %cst_14 : f32 to vector<128x1xf32>
    %24 = arith.addf %23, %22 : vector<128x1xf32>
    %cst_15 = arith.constant 1.000000e+00 : f32
    %25 = vector.broadcast %cst_15 : f32 to vector<128x1xf32>
    %26 = arith.divf %25, %24 : vector<128x1xf32>
    %cst_16 = arith.constant 1.000000e+00 : f32
    %27 = vector.broadcast %cst_16 : f32 to vector<128x1xf32>
    %28 = arith.subf %27, %26 : vector<128x1xf32>
    %29 = vector.broadcast %26 : vector<128x1xf32> to vector<128x128xf32>
    %30 = arith.mulf %29, %0 : vector<128x128xf32>
    %31 = vector.broadcast %28 : vector<128x1xf32> to vector<128x128xf32>
    %32 = arith.mulf %31, %1 : vector<128x128xf32>
    %33 = arith.addf %30, %32 : vector<128x128xf32>
    %cst_17 = arith.constant dense<0.000000e+00> : vector<128xf32>
    %34 = vector.multi_reduction <add>, %33, %cst_17 [1] : vector<128x128xf32> to vector<128xf32>
    %35 = vector.shape_cast %34 : vector<128xf32> to vector<128x1xf32>
    %cst_18 = arith.constant 1.280000e+02 : f32
    %36 = vector.broadcast %cst_18 : f32 to vector<128x1xf32>
    %37 = arith.divf %35, %36 : vector<128x1xf32>
    %38 = vector.broadcast %37 : vector<128x1xf32> to vector<128x128xf32>
    %39 = arith.subf %33, %38 : vector<128x128xf32>
    %40 = arith.mulf %39, %39 : vector<128x128xf32>
    %cst_19 = arith.constant dense<0.000000e+00> : vector<128xf32>
    %41 = vector.multi_reduction <add>, %40, %cst_19 [1] : vector<128x128xf32> to vector<128xf32>
    %42 = vector.shape_cast %41 : vector<128xf32> to vector<128x1xf32>
    %cst_20 = arith.constant 1.280000e+02 : f32
    %43 = vector.broadcast %cst_20 : f32 to vector<128x1xf32>
    %44 = arith.divf %42, %43 : vector<128x1xf32>
    %cst_21 = arith.constant 9.99999974E-6 : f32
    %45 = vector.broadcast %cst_21 : f32 to vector<128x1xf32>
    %46 = arith.addf %44, %45 : vector<128x1xf32>
    %47 = math.rsqrt %46 : vector<128x1xf32>
    %48 = vector.broadcast %47 : vector<128x1xf32> to vector<128x128xf32>
    %49 = arith.mulf %39, %48 : vector<128x128xf32>
    %c0_22 = arith.constant 0 : index
    %c0_23 = arith.constant 0 : index
    %50 = vector.load %arg7[%c0_22, %c0_23] : memref<1x128xf32, #tpu.memory_space<vmem>>, vector<1x128xf32>
    %51 = vector.broadcast %50 : vector<1x128xf32> to vector<128x128xf32>
    %52 = arith.mulf %49, %51 : vector<128x128xf32>
    %c0_24 = arith.constant 0 : index
    %c0_25 = arith.constant 0 : index
    %53 = vector.load %arg8[%c0_24, %c0_25] : memref<1x128xf32, #tpu.memory_space<vmem>>, vector<1x128xf32>
    %54 = vector.broadcast %53 : vector<1x128xf32> to vector<128x128xf32>
    %55 = arith.addf %52, %54 : vector<128x128xf32>
    %56 = arith.truncf %55 : vector<128x128xf32> to vector<128x128xbf16>
    %c0_26 = arith.constant 0 : index
    %c0_27 = arith.constant 0 : index
    %57 = vector.load %arg9[%c0_26, %c0_27] : memref<128x256xbf16, #tpu.memory_space<vmem>>, vector<128x256xbf16>
    %cst_28 = arith.constant dense<0.000000e+00> : vector<128x256xf32>
    %58 = tpu.matmul %56, %57, %cst_28 {dimension_numbers = #tpu.dot_dimension_numbers<[1], [0], [0], [1], [0, 0, 1, 1], [], []>} : vector<128x128xbf16>, vector<128x256xbf16>, vector<128x256xf32> -> vector<128x256xf32>
    %c0_29 = arith.constant 0 : index
    %c0_30 = arith.constant 0 : index
    %59 = vector.load %arg10[%c0_29, %c0_30] : memref<1x256xf32, #tpu.memory_space<vmem>>, vector<1x256xf32>
    %60 = vector.broadcast %59 : vector<1x256xf32> to vector<128x256xf32>
    %61 = arith.addf %58, %60 : vector<128x256xf32>
    %cst_31 = arith.constant 0.000000e+00 : f32
    %62 = vector.broadcast %cst_31 : f32 to vector<128x256xf32>
    %63 = arith.maximumf %61, %62 : vector<128x256xf32>
    %64 = arith.truncf %63 : vector<128x256xf32> to vector<128x256xbf16>
    %c0_32 = arith.constant 0 : index
    %c0_33 = arith.constant 0 : index
    %65 = vector.load %arg11[%c0_32, %c0_33] : memref<256x128xbf16, #tpu.memory_space<vmem>>, vector<256x128xbf16>
    %cst_34 = arith.constant dense<0.000000e+00> : vector<128x128xf32>
    %66 = tpu.matmul %64, %65, %cst_34 {dimension_numbers = #tpu.dot_dimension_numbers<[1], [0], [0], [1], [0, 0, 1, 1], [], []>} : vector<128x256xbf16>, vector<256x128xbf16>, vector<128x128xf32> -> vector<128x128xf32>
    %c0_35 = arith.constant 0 : index
    %c0_36 = arith.constant 0 : index
    %67 = vector.load %arg12[%c0_35, %c0_36] : memref<1x128xf32, #tpu.memory_space<vmem>>, vector<1x128xf32>
    %68 = vector.broadcast %67 : vector<1x128xf32> to vector<128x128xf32>
    %69 = arith.addf %66, %68 : vector<128x128xf32>
    %c0_37 = arith.constant 0 : index
    %c0_38 = arith.constant 0 : index
    %70 = vector.load %arg13[%c0_37, %c0_38] : memref<128x128xf32, #tpu.memory_space<vmem>>, vector<128x128xf32>
    tpu.vector_store %arg13[%c0_37, %c0_38], %69 {strides = array<i32>} : memref<128x128xf32, #tpu.memory_space<vmem>>, vector<128x128xf32>,
    return
  }
  func.func @transform_0(%arg0: i32) -> (i32, i32) {
    %c0_i32 = arith.constant 0 : i32
    %c0_i32_0 = arith.constant 0 : i32
    return %arg0, %c0_i32 : i32, i32
  }
  func.func @transform_1(%arg0: i32) -> (i32, i32) {
    %c0_i32 = arith.constant 0 : i32
    %c0_i32_0 = arith.constant 0 : i32
    return %arg0, %c0_i32 : i32, i32
  }
  func.func @transform_2(%arg0: i32) -> (i32, i32) {
    %c0_i32 = arith.constant 0 : i32
    %c0_i32_0 = arith.constant 0 : i32
    %c0_i32_1 = arith.constant 0 : i32
    return %c0_i32, %c0_i32_0 : i32, i32
  }
  func.func @transform_3(%arg0: i32) -> (i32, i32) {
    %c0_i32 = arith.constant 0 : i32
    %c0_i32_0 = arith.constant 0 : i32
    %c0_i32_1 = arith.constant 0 : i32
    return %c0_i32, %c0_i32_0 : i32, i32
  }
  func.func @transform_4(%arg0: i32) -> (i32, i32) {
    %c0_i32 = arith.constant 0 : i32
    %c0_i32_0 = arith.constant 0 : i32
    %c0_i32_1 = arith.constant 0 : i32
    return %c0_i32, %c0_i32_0 : i32, i32
  }
  func.func @transform_5(%arg0: i32) -> (i32, i32) {
    %c0_i32 = arith.constant 0 : i32
    %c0_i32_0 = arith.constant 0 : i32
    %c0_i32_1 = arith.constant 0 : i32
    return %c0_i32, %c0_i32_0 : i32, i32
  }
  func.func @transform_6(%arg0: i32) -> (i32, i32) {
    %c0_i32 = arith.constant 0 : i32
    %c0_i32_0 = arith.constant 0 : i32
    %c0_i32_1 = arith.constant 0 : i32
    return %c0_i32, %c0_i32_0 : i32, i32
  }
  func.func @transform_7(%arg0: i32) -> (i32, i32) {
    %c0_i32 = arith.constant 0 : i32
    %c0_i32_0 = arith.constant 0 : i32
    %c0_i32_1 = arith.constant 0 : i32
    return %c0_i32, %c0_i32_0 : i32, i32
  }
  func.func @transform_8(%arg0: i32) -> (i32, i32) {
    %c0_i32 = arith.constant 0 : i32
    %c0_i32_0 = arith.constant 0 : i32
    %c0_i32_1 = arith.constant 0 : i32
    return %c0_i32, %c0_i32_0 : i32, i32
  }
  func.func @transform_9(%arg0: i32) -> (i32, i32) {
    %c0_i32 = arith.constant 0 : i32
    %c0_i32_0 = arith.constant 0 : i32
    %c0_i32_1 = arith.constant 0 : i32
    return %c0_i32, %c0_i32_0 : i32, i32
  }
  func.func @transform_10(%arg0: i32) -> (i32, i32) {
    %c0_i32 = arith.constant 0 : i32
    %c0_i32_0 = arith.constant 0 : i32
    %c0_i32_1 = arith.constant 0 : i32
    return %c0_i32, %c0_i32_0 : i32, i32
  }
  func.func @transform_11(%arg0: i32) -> (i32, i32) {
    %c0_i32 = arith.constant 0 : i32
    %c0_i32_0 = arith.constant 0 : i32
    %c0_i32_1 = arith.constant 0 : i32
    return %c0_i32, %c0_i32_0 : i32, i32
  }
  func.func @transform_12(%arg0: i32) -> (i32, i32) {
    %c0_i32 = arith.constant 0 : i32
    %c0_i32_0 = arith.constant 0 : i32
    return %arg0, %c0_i32 : i32, i32
  }
}

</mosaic_0001>

<bundles_post_ra>
// kernel: tpu_custom_call.1
= control target key start
LH: loop header
LB: loop body
LE: loop exit
PB: predicated region body
PF: predicated region fallthrough
CT: control target
= control target key end

     0   :  { %s4349_s0 = inlined_call_operand.hbm [shape: f32[256,128], index: 0, kind: input, shape index: {}]   ;;  %s4350_s1 = inlined_call_operand.hbm [shape: f32[256,128], index: 1, kind: input, shape index: {}]   ;;  %s4351_s2 = inlined_call_operand.hbm [shape: bf16[256,512], index: 2, kind: input, shape index: {}]   ;;  %s4352_s3 = inlined_call_operand.vmem [shape: f32[1,512], index: 3, kind: input, shape index: {}]   ;;  %s4353_s4 = inlined_call_operand.vmem [shape: f32[1,512], index: 4, kind: input, shape index: {}]   ;;  %s4354_s5 = inlined_call_operand.<no memory space> [shape: f32[1,1], index: 5, kind: input, shape index: {}]   ;;  %s4355_s6 = inlined_call_operand.vmem [shape: f32[1,128], index: 6, kind: input, shape index: {}]   ;;  %s4356_s7 = inlined_call_operand.vmem [shape: f32[1,128], index: 7, kind: input, shape index: {}]   ;;  %s4357_s8 = inlined_call_operand.hbm [shape: bf16[128,256], index: 8, kind: input, shape index: {}]   ;;  %s4358_s9 = inlined_call_operand.vmem [shape: f32[1,256], index: 9, kind: input, shape index: {}]   ;;  %s4359_s10 = inlined_call_operand.hbm [shape: bf16[256,128], index: 10, kind: input, shape index: {}]   ;;  %s4360_s11 = inlined_call_operand.vmem [shape: f32[1,128], index: 11, kind: input, shape index: {}]   ;;  %s4361_s12 = inlined_call_operand.hbm [shape: f32[256,128], index: 12, kind: output, shape index: {}]  }
   0x1   :  { %4373 = sst [smem:[#allocation22_spill]] %s4349_s0  ;;  %v17_v0 = vstv %s4354_s5 }
   0x2   :  { %4374 = sst [smem:[#allocation23_spill]] %s4351_s2  ;;  %18 = vst [vmem:[#allocation2] sm:$0x1] %v17_v0 }
   0x3   :  { %4375 = sst [smem:[#allocation24_spill]] %s4357_s8 }
   0x4   :  { %4376 = sst [smem:[#allocation25_spill]] %s4359_s10 }
   0x5   :  { %4377 = sst [smem:[#allocation26_spill]] %s4360_s11 }
   0x6   :  { %4378 = sst [smem:[#allocation27_spill]] %s4361_s12 }
   0x7   :  { %19 = vsyncpa [#allocation4], 0 }
   0x8   :  { %21 = vsyncpa [#allocation4 + $0x1], 0 }
   0x9   :  { %22 = vsyncpa [#allocation7], 0 }
   0xa   :  { %24 = vsyncpa [#allocation7 + $0x1], 0 }
   0xb   :  { %25 = vsyncpa [#allocation10], 0 }
   0xc   :  { %26 = vsyncpa [#allocation5], 0 }
   0xd   :  { %28 = vsyncpa [#allocation5 + $0x1], 0  ;;  %s3515_s23 = smov 0   ;;  %s3517_s24 = smov 0  }
   0xe   :  { %s3519_s25 = smov 0   ;;  %s3521_s26 = smov 0  }
   0xf LB: > { %4379 = sst [smem:[#allocation18_spill]] %s3418_s23  ;;  %s3536_s5 = sadd.s32 4294967295, %s3430_s26   ;;  %s3430_s26 = sphi %s3521_s26, %s4413_s26   ;;  %s3426_s25 = sphi %s3519_s25, %s4410_s25   ;;  %s3422_s24 = sphi %s3517_s24, %s4412_s24   ;;  %s3418_s23 = sphi %s3515_s23, %s4411_s23  }
  0x10   : > { %4380 = sst [smem:[#allocation19_spill]] %s3426_s25  ;;  %s2660_s27 = sadd.s32 4294967294, %s3430_s26  }
  0x11   : > { %p54_p0 = scmp.ne.s32.totalorder %s3422_s24, %s3418_s23  ;;  %p4362_p1 = scmp.eq.s32.totalorder %s3536_s5, 0 }
  0x12   : > { %p320_p3 = scmp.eq.s32.totalorder %s2660_s27, 1  ;;  %p2661_p5 = scmp.ge.s32.totalorder %s3430_s26, 1 }
  0x13   : > { %p3545_p4 = por %p4362_p1, %p54_p0  ;;  %p327_p7 = scmp.lt.s32.totalorder %s3430_s26, 3 }
  0x14   : > { %p3550_p6 = por %p320_p3, %p54_p0  ;;  %s3432_s13 = smov [#allocation8]  }
  0x15   : > { %s4381_s28 = scalar_select %p3545_p4, 1, 0 }
  0x16   : > { %s4382_s29 = scalar_select %p3550_p6, 1, 0 }
  0x17   : > { %p3555_p8 = pnand %p2661_p5, %p327_p7  ;;  %s339_s14 = sshll.u32 %s3432_s13, 4  ;;  %s3559_s14 = int_to_ptr.vmem [resolvable:$true] %s339_s14 }
  0x18   : > { %4383 = sst [smem:[#allocation20_spill]] %s4382_s29  ;;  %s3433_s16 = smov [#allocation9]  }
  0x19   : > { %s4384_s30 = scalar_select %p3555_p8, 1, 0 }
  0x1a   : > { %p2869_p9 = pneg %p3555_p8  ;;  %s367_s17 = sshll.u32 %s3433_s16, 4  ;;  %s3570_s17 = int_to_ptr.vmem [resolvable:$true] %s367_s17 }
  0x1b   : > { %s4386_s2 = sld [smem:[#allocation23_spill]] }
  0x1c   : > { %p3566_p11 = pnand %p2869_p9, %p4362_p1 }
  0x1e   : > { %p3580_p13 = pneg %p3566_p11 }
  0x21   : > { %s3208_s20 = scalar_lea.hbm %s4386_s2, 8192 }
  0x22   : > { %p3209_p12 = scmp.ne.s32.totalorder %s4386_s2, %s3208_s20  ;;  %p3215_p5 = scmp.lt.u32.totalorder %s3208_s20, %s4386_s2 }
  0x24   : > { %p3211_p0 = pnand %p3580_p13, %p3209_p12 }
  0x26   : > { %p3212_p3 = pneg %p3211_p0 }
  0x28   : > { %p3217_p7 = pnand %p3215_p5, %p3212_p3 }
  0x2a   : > { %3220 = shalt.err (!%p3217_p7)
}
  0x2b   : > { %s3221_s18 = scalar_lea.vmem %s3559_s14, 8192  ;;  %p3229_p2 = scmp.lt.s32.totalorder %s3559_s14, %s3559_s14 }
  0x2c   : > { %p3222_p9 = scmp.ne.s32.totalorder %s3559_s14, %s3221_s18  ;;  %p3230_p6 = scmp.lt.s32.totalorder %s3221_s18, %s3221_s18 }
  0x2e   : > { %p3224_p10 = pnand %p3222_p9, %p3580_p13  ;;  %p3231_p12 = por %p3230_p6, %p3229_p2 }
  0x30   : > { %p3225_p1 = pneg %p3224_p10 }
  0x32   : > { %p3232_p0 = pnand %p3231_p12, %p3225_p1 }
  0x34   : > { %3235 = shalt.err (!%p3232_p0)
}
  0x35   : > { %s3434_s19 = smov 256   ;;  %s3435_s20 = smov 16  }
  0x36   : > { %2872 = dma.hbm_to_vmem [thread:$0]  (!%p3566_p11), %s4386_s2, 8192, %s3559_s14, [#allocation7], %s3434_s19, %s3434_s19, %s3435_s20  }
  0x37   : > { %s4388_s8 = sld [smem:[#allocation24_spill]] }
  0x3d   : > { %s3236_s29 = scalar_lea.hbm %s4388_s8, 2048 }
  0x3e   : > { %p3237_p2 = scmp.ne.s32.totalorder %s4388_s8, %s3236_s29  ;;  %p3243_p10 = scmp.lt.u32.totalorder %s3236_s29, %s4388_s8 }
  0x40   : > { %p3239_p1 = pnand %p3237_p2, %p3580_p13 }
  0x42   : > { %p3240_p6 = pneg %p3239_p1 }
  0x44   : > { %p3245_p3 = pnand %p3243_p10, %p3240_p6 }
  0x46   : > { %3248 = shalt.err (!%p3245_p3)
}
  0x47   : > { %s3249_s14 = scalar_lea.vmem %s3570_s17, 2048  ;;  %p3257_p12 = scmp.lt.s32.totalorder %s3570_s17, %s3570_s17 }
  0x48   : > { %p3250_p5 = scmp.ne.s32.totalorder %s3570_s17, %s3249_s14  ;;  %p3258_p0 = scmp.lt.s32.totalorder %s3249_s14, %s3249_s14 }
  0x4a   : > { %p3252_p7 = pnand %p3250_p5, %p3580_p13  ;;  %p3259_p2 = por %p3258_p0, %p3257_p12 }
  0x4c   : > { %p3253_p9 = pneg %p3252_p7 }
  0x4e   : > { %p3260_p1 = pnand %p3259_p2, %p3253_p9 }
  0x50   : > { %3263 = shalt.err (!%p3260_p1)
}
  0x51   : > { %s4368_s12 = smov 128   ;;  %s4370_s11 = smov 8  }
  0x52   : > { %2875 = dma.hbm_to_vmem [thread:$0]  (!%p3566_p11), %s4388_s8, 2048, %s3570_s17, [#allocation10], %s4368_s12, %s4368_s12, %s4370_s11  }
  0x53   : > { %s3438_s19 = smov [#allocation11]   ;;  %s4389_s10 = sld [smem:[#allocation25_spill]] }
  0x54   : > { %s383_s20 = sshll.u32 %s3438_s19, 4  ;;  %s384_s20 = int_to_ptr.vmem [resolvable:$true] %s383_s20 }
  0x59   : > { %s3264_s13 = scalar_lea.hbm %s4389_s10, 2048 }
  0x5a   : > { %p3265_p6 = scmp.ne.s32.totalorder %s4389_s10, %s3264_s13  ;;  %p3271_p5 = scmp.lt.u32.totalorder %s3264_s13, %s4389_s10 }
  0x5c   : > { %p3267_p10 = pnand %p3265_p6, %p3580_p13 }
  0x5e   : > { %p3268_p3 = pneg %p3267_p10 }
  0x60   : > { %p3273_p7 = pnand %p3271_p5, %p3268_p3 }
  0x62   : > { %3276 = shalt.err (!%p3273_p7)
}
  0x63   : > { %s3277_s17 = scalar_lea.vmem %s384_s20, 2048  ;;  %p3285_p2 = scmp.lt.s32.totalorder %s384_s20, %s384_s20 }
  0x64   : > { %p3278_p9 = scmp.ne.s32.totalorder %s384_s20, %s3277_s17  ;;  %p3286_p1 = scmp.lt.s32.totalorder %s3277_s17, %s3277_s17 }
  0x66   : > { %p3280_p12 = pnand %p3278_p9, %p3580_p13  ;;  %p3287_p4 = por %p3286_p1, %p3285_p2 }
  0x68   : > { %p3281_p0 = pneg %p3280_p12 }
  0x6a   : > { %p3288_p8 = pnand %p3287_p4, %p3281_p0 }
  0x6c   : > { %3291 = shalt.err (!%p3288_p8)
}
  0x6d   : > { %s3439_s23 = smov 64   ;;  %s3440_s2 = smov 4  }
  0x6e   : > { %2878 = dma.hbm_to_vmem [thread:$0]  (!%p3566_p11), %s4389_s10, 2048, %s384_s20, [#allocation10], %s3439_s23, %s3439_s23, %s3440_s2  }
  0x6f   : > { %s3646_s19 = sadd.s32 1, %s3430_s26   ;;  %s41_s22 = sadd.s32 1, %s3426_s25 }
  0x70   : > { %s38_s21 = ssub.s32 %s3430_s26, %s3646_s19  ;;  %p48_p8 = scmp.ne.s32.totalorder %s3426_s25, %s3422_s24 }
  0x71   : > { %p39_p4 = scmp.eq.s32.totalorder %s38_s21, 0  ;;  %p49_p13 = scmp.eq.s32.totalorder %s3430_s26, 0 }
  0x72   : > { %p2893_p6 = scmp.lt.s32.totalorder %s3430_s26, 2  ;;  %p4391_p3 = scmp.eq.s32.totalorder %s3536_s5, 1 }
  0x73   : > { %s3656_s13 = scalar_select %p39_p4, %s3426_s25, %s41_s22  }
  0x74   : > { %p50_p10 = por %p49_p13, %p48_p8  ;;  %p3660_p5 = por %p4391_p3, %p48_p8 }
  0x75   : > { %4390 = sst [smem:[#allocation21_spill]] %s3656_s13  ;;  %s400_s15 = sand.u32 1, %s3426_s25  }
  0x76   : > { %s2784_s18 = sshll.u32 %s3430_s26, 11  ;;  %s3666_s20 = sshll.u32 %s400_s15, 7 }
  0x77   : > { %s4393_s0 = sld [smem:[#allocation22_spill]]  ;;  %s404_s2 = scalar_lea.vmem [#allocation3], %s3666_s20 }
  0x78   : > { %s411_s27 = sshll.u32 %s404_s2, 4  ;;  %p3674_p11 = pnand %p2893_p6, %p50_p10  ;;  %s3678_s27 = int_to_ptr.vmem [resolvable:$true] %s411_s27 }
  0x79   : > { %s3683_s14 = scalar_lea.hbm %s4350_s1, %s2784_s18  ;;  %s3685_s17 = scalar_lea.sflag [#allocation4], %s400_s15 }
  0x7a   : > { %p3294_p9 = pneg %p3674_p11 }
  0x7d   : > { %s3671_s23 = scalar_lea.hbm %s4393_s0, %s2784_s18  ;;  %s3297_s8 = scalar_lea.hbm %s4393_s0, 4096 }
  0x7e   : > { %s3292_s12 = scalar_lea.hbm %s3671_s23, 2048  ;;  %p3298_p2 = scmp.lt.u32.totalorder %s3671_s23, %s4393_s0 }
  0x7f   : > { %p3293_p7 = scmp.ne.s32.totalorder %s3671_s23, %s3292_s12  ;;  %p3299_p1 = scmp.lt.u32.totalorder %s3297_s8, %s3292_s12 }
  0x80   : > { %p3301_p8 = scmp.lt.u32.totalorder %s3292_s12, %s3671_s23 }
  0x81   : > { %p3295_p12 = pnand %p3294_p9, %p3293_p7  ;;  %p3300_p4 = por %p3299_p1, %p3298_p2 }
  0x83   : > { %p3296_p0 = pneg %p3295_p12  ;;  %p3302_p13 = por %p3301_p8, %p3300_p4 }
  0x85   : > { %p3303_p6 = pnand %p3302_p13, %p3296_p0 }
  0x87   : > { %3306 = shalt.err (!%p3303_p6)
}
  0x88   : > { %s3307_s15 = scalar_lea.vmem %s3678_s27, 2048  ;;  %s3441_s11 = smov [#allocation3]  }
  0x89   : > { %p3308_p10 = scmp.ne.s32.totalorder %s3678_s27, %s3307_s15  ;;  %s3312_s18 = sshll.u32 %s3441_s11, 4  ;;  %s3313_s18 = int_to_ptr.vmem [resolvable:$false] %s3312_s18 }
  0x8a   : > { %s3314_s10 = scalar_lea.vmem %s3313_s18, 4096  ;;  %p3315_p12 = scmp.lt.s32.totalorder %s3678_s27, %s3313_s18 }
  0x8b   : > { %p3310_p3 = pnand %p3308_p10, %p3294_p9  ;;  %p3316_p2 = scmp.lt.s32.totalorder %s3314_s10, %s3307_s15 }
  0x8d   : > { %p3311_p7 = pneg %p3310_p3  ;;  %p3317_p1 = por %p3316_p2, %p3315_p12 }
  0x8f   : > { %p3318_p4 = pnand %p3317_p1, %p3311_p7 }
  0x91   : > { %3321 = shalt.err (!%p3318_p4)
}
  0x92   : > { %s4395_s8 = smov 8   ;;  %s4396_s12 = smov 128  }
  0x93   : > { %2882 = dma.hbm_to_vmem [thread:$0]  (!%p3674_p11), %s3671_s23, 2048, %s3678_s27, %s3685_s17, %s4396_s12, %s4396_s12, %s4395_s8  }
  0x94   : > { %s425_s13 = scalar_lea.vmem [#allocation6], %s3666_s20  ;;  %s421_s22 = sand.u32 1, %s3430_s26  }
  0x95   : > { %s432_s21 = sshll.u32 %s425_s13, 4  ;;  %s3720_s2 = scalar_lea.sflag [#allocation7], %s421_s22  ;;  %s3718_s21 = int_to_ptr.vmem [resolvable:$true] %s432_s21 }
  0x96   : > { %s3322_s15 = scalar_lea.hbm %s3683_s14, 2048  ;;  %s3327_s10 = scalar_lea.hbm %s4350_s1, 4096 }
  0x97   : > { %p3323_p0 = scmp.ne.s32.totalorder %s3683_s14, %s3322_s15  ;;  %p3328_p6 = scmp.lt.u32.totalorder %s3683_s14, %s4350_s1 }
  0x98   : > { %p3329_p10 = scmp.lt.u32.totalorder %s3327_s10, %s3322_s15  ;;  %p3331_p7 = scmp.lt.u32.totalorder %s3322_s15, %s3683_s14 }
  0x99   : > { %p3325_p8 = pnand %p3323_p0, %p3294_p9 }
  0x9a   : > { %p3330_p3 = por %p3329_p10, %p3328_p6 }
  0x9b   : > { %p3326_p13 = pneg %p3325_p8 }
  0x9c   : > { %p3332_p12 = por %p3331_p7, %p3330_p3 }
  0x9e   : > { %p3333_p2 = pnand %p3332_p12, %p3326_p13 }
  0xa0   : > { %3336 = shalt.err (!%p3333_p2)
}
  0xa1   : > { %s3337_s20 = scalar_lea.vmem %s3718_s21, 2048  ;;  %s3442_s23 = smov [#allocation6]  }
  0xa2   : > { %p3338_p1 = scmp.ne.s32.totalorder %s3718_s21, %s3337_s20  ;;  %s3342_s27 = sshll.u32 %s3442_s23, 4  ;;  %s3343_s27 = int_to_ptr.vmem [resolvable:$false] %s3342_s27 }
  0xa3   : > { %s3344_s0 = scalar_lea.vmem %s3343_s27, 4096  ;;  %p3345_p8 = scmp.lt.s32.totalorder %s3718_s21, %s3343_s27 }
  0xa4   : > { %p3340_p4 = pnand %p3338_p1, %p3294_p9  ;;  %p3346_p6 = scmp.lt.s32.totalorder %s3344_s0, %s3337_s20 }
  0xa6   : > { %p3341_p0 = pneg %p3340_p4  ;;  %p3347_p10 = por %p3346_p6, %p3345_p8 }
  0xa8   : > { %p3348_p3 = pnand %p3347_p10, %p3341_p0 }
  0xaa   : > { %3351 = shalt.err (!%p3348_p3)
}
  0xab   : > { %2885 = dma.hbm_to_vmem [thread:$0]  (!%p3674_p11), %s3683_s14, 2048, %s3718_s21, %s3720_s2, %s4396_s12, %s4396_s12, %s4395_s8  }
  0xac   : > { %p4397_p9 = scmp.ne.s32.totalorder %s4384_s30, 0 }
  0xad   : > { %s3752_s25 = sand.u32 (!%p4397_p9), 1, %s3422_s24   ;;  %p4398_p13 = scmp.ne.s32.totalorder (!%p4397_p9), %s4381_s28, 0 }
  0xae   : > { %444 = sbr.rel (%p4397_p9) target bundleno = 1631 (0x65f), region = 68  ;;  %s3755_s17 = sshll.u32 (!%p4397_p9), %s3752_s25, 7 }
  0xaf   : > { %s447_s29 = scalar_lea.sflag (!%p4397_p9), [#allocation4], %s3752_s25  ;;  %s3759_s13 = scalar_lea.vmem (!%p4397_p9), [#allocation3], %s3755_s17 }
  0xb5   : > { %3397 = dma.done.wait (%p4398_p13), %s447_s29, 2048  }
  0xb6   : > { %3399 = vsyncadd (%p4398_p13), %s447_s29, 4294965248  ;;  %s455_s30 = sand.u32 1, %s3536_s5   ;;  %s3767_s8 = scalar_lea.vmem [#allocation6], %s3755_s17 }
  0xb7   : > { %s456_s14 = scalar_lea.sflag [#allocation7], %s455_s30 }
  0xb8   : > { %3401 = dma.done.wait (%p4398_p13), %s456_s14, 2048  }
  0xb9   : > { %3403 = vsyncadd (%p4398_p13), %s456_s14, 4294965248  ;;  %p4399_p11 = scmp.eq.s32.totalorder %s3536_s5, 0 }
  0xbb   : > { %3405 = dma.done.wait (%p4399_p11), [#allocation7], 8192   ;;  %p4400_p7 = pmov %p4399_p11 }
  0xbd   : > { %3407 = vsyncadd (%p4400_p7), [#allocation7], 4294959104  ;;  %p4401_p12 = pmov %p4400_p7 }
  0xbe   : > { %p4402_p2 = pmov %p4400_p7 }
  0xbf   : > { %3409 = dma.done.wait (%p4401_p12), [#allocation10], 4096  }
  0xc0   : > { %3411 = vsyncadd (%p4402_p2), [#allocation10], 4294963200  ;;  %v2944_v1 = vld [vmem:[#allocation8 + $0x4] ss:$16 sps:$4 sm:$0xff]   ;;  %v2946_v2 = vld [vmem:[#allocation8 + $0xc] ss:$16 sps:$4 sm:$0xff]  }
  0xc1   : > { %975 = vmatprep.subr.bf16.mxu0 %v2944_v1  ;;  %v2948_v3 = vld [vmem:[#allocation8] ss:$16 sps:$4 sm:$0xff]   ;;  %v2949_v4 = vld [vmem:[#allocation8 + $0x8] ss:$16 sps:$4 sm:$0xff]   ;;  %1088 = vmatprep.subr.bf16.mxu1 %v2946_v2  ;;  %v2950_v5 = vld [vmem:[#allocation8 + $0x24] ss:$16 sps:$4 sm:$0xff]  }
  0xc2   : > { %976 = vmatpush1.bf16.msra.mxu0 %v2948_v3  ;;  %1089 = vmatpush1.bf16.msra.mxu1 %v2949_v4  ;;  %v2952_v6 = vld [vmem:[#allocation8 + $0x2c] ss:$16 sps:$4 sm:$0xff]   ;;  %v2954_v7 = vld [vmem:[#allocation8 + $0x20] ss:$16 sps:$4 sm:$0xff]   ;;  %v2955_v8 = vld [vmem:[#allocation8 + $0x28] ss:$16 sps:$4 sm:$0xff]  }
  0xc3   : > { %977 = vmatprep.subr.bf16.mxu0 %v2950_v5  ;;  %1090 = vmatprep.subr.bf16.mxu1 %v2952_v6  ;;  %v2956_v9 = vld [vmem:[#allocation8 + $0x44] ss:$16 sps:$4 sm:$0xff]   ;;  %v2958_v10 = vld [vmem:[#allocation8 + $0x4c] ss:$16 sps:$4 sm:$0xff]   ;;  %v2960_v11 = vld [vmem:[#allocation8 + $0x40] ss:$16 sps:$4 sm:$0xff]  }
  0xc4   : > { %v2961_v12 = vld [vmem:[#allocation8 + $0x48] ss:$16 sps:$4 sm:$0xff]   ;;  %v2962_v13 = vld [vmem:[#allocation8 + $0x64] ss:$16 sps:$4 sm:$0xff]   ;;  %v2964_v14 = vld [vmem:[#allocation8 + $0x6c] ss:$16 sps:$4 sm:$0xff]  }
  0xc5   : > { %v2966_v15 = vld [vmem:[#allocation8 + $0x60] ss:$16 sps:$4 sm:$0xff]   ;;  %v2967_v16 = vld [vmem:[#allocation8 + $0x68] ss:$16 sps:$4 sm:$0xff]   ;;  %v2968_v17 = vld [vmem:[#allocation8 + $0x84] ss:$16 sps:$4 sm:$0xff]  }
  0xc6   : > { %978 = vmatpush1.bf16.msra.mxu0 %v2954_v7  ;;  %1091 = vmatpush1.bf16.msra.mxu1 %v2955_v8  ;;  %v2970_v18 = vld [vmem:[#allocation8 + $0x8c] ss:$16 sps:$4 sm:$0xff]   ;;  %v2972_v19 = vld [vmem:[#allocation8 + $0x80] ss:$16 sps:$4 sm:$0xff]   ;;  %v2973_v20 = vld [vmem:[#allocation8 + $0x88] ss:$16 sps:$4 sm:$0xff]  }
  0xc7   : > { %979 = vmatprep.subr.bf16.mxu0 %v2956_v9  ;;  %1092 = vmatprep.subr.bf16.mxu1 %v2958_v10  ;;  %v2974_v21 = vld [vmem:[#allocation8 + $0xa4] ss:$16 sps:$4 sm:$0xff]   ;;  %v2976_v22 = vld [vmem:[#allocation8 + $0xac] ss:$16 sps:$4 sm:$0xff]   ;;  %v2978_v23 = vld [vmem:[#allocation8 + $0xa0] ss:$16 sps:$4 sm:$0xff]  }
  0xc8   : > { %v2979_v24 = vld [vmem:[#allocation8 + $0xa8] ss:$16 sps:$4 sm:$0xff]   ;;  %v2980_v25 = vld [vmem:[#allocation8 + $0xc4] ss:$16 sps:$4 sm:$0xff]   ;;  %v2982_v26 = vld [vmem:[#allocation8 + $0xcc] ss:$16 sps:$4 sm:$0xff]  }
  0xc9   : > { %v2984_v27 = vld [vmem:[#allocation8 + $0xc0] ss:$16 sps:$4 sm:$0xff]   ;;  %v2985_v28 = vld [vmem:[#allocation8 + $0xc8] ss:$16 sps:$4 sm:$0xff]   ;;  %v2986_v29 = vld [vmem:[#allocation8 + $0xe4] ss:$16 sps:$4 sm:$0xff]  }
  0xca   : > { %980 = vmatpush1.bf16.msra.mxu0 %v2960_v11  ;;  %1093 = vmatpush1.bf16.msra.mxu1 %v2961_v12  ;;  %v2988_v30 = vld [vmem:[#allocation8 + $0xec] ss:$16 sps:$4 sm:$0xff]   ;;  %v2990_v31 = vld [vmem:[#allocation8 + $0xe0] ss:$16 sps:$4 sm:$0xff]   ;;  %v2991_v32 = vld [vmem:[#allocation8 + $0xe8] ss:$16 sps:$4 sm:$0xff]  }
  0xcb   : > { %981 = vmatprep.subr.bf16.mxu0 %v2962_v13  ;;  %1094 = vmatprep.subr.bf16.mxu1 %v2964_v14  ;;  %v2992_v33 = vld [vmem:[#allocation8 + $0x104] ss:$16 sps:$4 sm:$0xff]   ;;  %v2994_v34 = vld [vmem:[#allocation8 + $0x10c] ss:$16 sps:$4 sm:$0xff]   ;;  %v2996_v35 = vld [vmem:[#allocation8 + $0x100] ss:$16 sps:$4 sm:$0xff]  }
  0xcc   : > { %v2997_v36 = vld [vmem:[#allocation8 + $0x108] ss:$16 sps:$4 sm:$0xff]   ;;  %v2998_v37 = vld [vmem:[#allocation8 + $0x124] ss:$16 sps:$4 sm:$0xff]   ;;  %v3000_v38 = vld [vmem:[#allocation8 + $0x12c] ss:$16 sps:$4 sm:$0xff]  }
  0xcd   : > { %v3002_v39 = vld [vmem:[#allocation8 + $0x120] ss:$16 sps:$4 sm:$0xff]   ;;  %v3003_v40 = vld [vmem:[#allocation8 + $0x128] ss:$16 sps:$4 sm:$0xff]   ;;  %v3004_v41 = vld [vmem:[#allocation8 + $0x144] ss:$16 sps:$4 sm:$0xff]  }
  0xce   : > { %982 = vmatpush1.bf16.msra.mxu0 %v2966_v15  ;;  %1095 = vmatpush1.bf16.msra.mxu1 %v2967_v16  ;;  %v3006_v42 = vld [vmem:[#allocation8 + $0x14c] ss:$16 sps:$4 sm:$0xff]   ;;  %v3008_v43 = vld [vmem:[#allocation8 + $0x140] ss:$16 sps:$4 sm:$0xff]   ;;  %v3009_v44 = vld [vmem:[#allocation8 + $0x148] ss:$16 sps:$4 sm:$0xff]  }
  0xcf   : > { %983 = vmatprep.subr.bf16.mxu0 %v2968_v17  ;;  %1096 = vmatprep.subr.bf16.mxu1 %v2970_v18  ;;  %v3010_v45 = vld [vmem:[#allocation8 + $0x164] ss:$16 sps:$4 sm:$0xff]   ;;  %v3012_v46 = vld [vmem:[#allocation8 + $0x16c] ss:$16 sps:$4 sm:$0xff]   ;;  %v3014_v49 = vld [vmem:[#allocation8 + $0x160] ss:$16 sps:$4 sm:$0xff]  }
  0xd0   : > { %v537_v47 = vld [vmem:[%s3767_s8] sm:$0xff]  ;;  %v538_v48 = vld [vmem:[%s3767_s8 + $0x8] sm:$0xff]  ;;  %v539_v6 = vld [vmem:[%s3767_s8 + $0x10] sm:$0xff]  ;;  %s4403_s0 = sld [smem:[#allocation26_spill]]  ;;  %s4265_s29 = scalar_lea.vmem [#allocation12], %s3755_s17 }
  0xd1   : > { %v3015_v50 = vld [vmem:[#allocation8 + $0x168] ss:$16 sps:$4 sm:$0xff]   ;;  %v561_v51 = vpack.c.bf16 %v538_v48, %v537_v47  ;;  %v3016_v52 = vld [vmem:[#allocation8 + $0x184] ss:$16 sps:$4 sm:$0xff]   ;;  %v3018_v53 = vld [vmem:[#allocation8 + $0x18c] ss:$16 sps:$4 sm:$0xff]  }
  0xd2   : > { %984 = vmatpush1.bf16.msra.mxu0 %v2972_v19  ;;  %1097 = vmatpush1.bf16.msra.mxu1 %v2973_v20  ;;  %v3020_v54 = vld [vmem:[#allocation8 + $0x180] ss:$16 sps:$4 sm:$0xff]   ;;  %v3021_v55 = vld [vmem:[#allocation8 + $0x188] ss:$16 sps:$4 sm:$0xff]   ;;  %v3022_v56 = vld [vmem:[#allocation8 + $0x1a4] ss:$16 sps:$4 sm:$0xff]  }
  0xd3   : > { %985 = vmatprep.subr.bf16.mxu0 %v2974_v21  ;;  %1098 = vmatprep.subr.bf16.mxu1 %v2976_v22  ;;  %v3024_v57 = vld [vmem:[#allocation8 + $0x1ac] ss:$16 sps:$4 sm:$0xff]   ;;  %v3026_v58 = vld [vmem:[#allocation8 + $0x1a0] ss:$16 sps:$4 sm:$0xff]   ;;  %v3027_v59 = vld [vmem:[#allocation8 + $0x1a8] ss:$16 sps:$4 sm:$0xff]  }
  0xd4   : > { %1007 = vmatprep.mubr.bf16.mxu0 %v561_v51  ;;  %1120 = vmatprep.mubr.bf16.mxu1 %v561_v51  ;;  %v3028_v60 = vld [vmem:[#allocation8 + $0x1c4] ss:$16 sps:$4 sm:$0xff]   ;;  %v3030_v61 = vld [vmem:[#allocation8 + $0x1cc] ss:$16 sps:$4 sm:$0xff]   ;;  %v3032_v62 = vld [vmem:[#allocation8 + $0x1c0] ss:$16 sps:$4 sm:$0xff]  }
  0xd5   : > { %v3033_v63 = vld [vmem:[#allocation8 + $0x1c8] ss:$16 sps:$4 sm:$0xff]   ;;  %v3034_v0 = vld [vmem:[#allocation8 + $0x1e4] ss:$16 sps:$4 sm:$0xff]   ;;  %v3036_v1 = vld [vmem:[#allocation8 + $0x1ec] ss:$16 sps:$4 sm:$0xff]  }
  0xd6   : > { %986 = vmatpush1.bf16.msra.mxu0 %v2978_v23  ;;  %1099 = vmatpush1.bf16.msra.mxu1 %v2979_v24  ;;  %v3038_v2 = vld [vmem:[#allocation8 + $0x1e0] ss:$16 sps:$4 sm:$0xff]   ;;  %v3039_v3 = vld [vmem:[#allocation8 + $0x1e8] ss:$16 sps:$4 sm:$0xff]   ;;  %s2786_s17 = sshll.u32 %s3536_s5, 11  ;;  %s2523_s5 = scalar_lea.sflag [#allocation5], %s3752_s25 }
  0xd7   : > { %987 = vmatprep.subr.bf16.mxu0 %v2980_v25  ;;  %1100 = vmatprep.subr.bf16.mxu1 %v2982_v26  ;;  %v521_v4 = vld [vmem:[%s3759_s13] sm:$0xff]  ;;  %v522_v5 = vld [vmem:[%s3759_s13 + $0x8] sm:$0xff]  ;;  %v540_v7 = vld [vmem:[%s3767_s8 + $0x18] sm:$0xff]  ;;  %s3444_s21 = smov [#allocation12]  }
  0xd8   : > { %v553_v8 = vpack.c.bf16 %v522_v5, %v521_v4  ;;  %v562_v9 = vpack.c.bf16 %v540_v7, %v539_v6  ;;  %v523_v10 = vld [vmem:[%s3759_s13 + $0x10] sm:$0xff]  ;;  %v524_v11 = vld [vmem:[%s3759_s13 + $0x18] sm:$0xff]  ;;  %v541_v12 = vld [vmem:[%s3767_s8 + $0x20] sm:$0xff]  ;;  %s3356_s22 = sshll.u32 %s3444_s21, 4  ;;  %s3357_s22 = int_to_ptr.vmem [resolvable:$false] %s3356_s22 }
  0xd9   : > { %v542_v13 = vld [vmem:[%s3767_s8 + $0x28] sm:$0xff]  ;;  %v554_v14 = vpack.c.bf16 %v524_v11, %v523_v10  ;;  %v525_v16 = vld [vmem:[%s3759_s13 + $0x20] sm:$0xff]  ;;  %v543_v18 = vld [vmem:[%s3767_s8 + $0x30] sm:$0xff]  ;;  %s3358_s2 = scalar_lea.vmem %s3357_s22, 4096 }
  0xda   : > { %988 = vmatpush1.bf16.msra.mxu0 %v2984_v27  ;;  %1101 = vmatpush1.bf16.msra.mxu1 %v2985_v28  ;;  %v563_v15 = vpack.c.bf16 %v542_v13, %v541_v12  ;;  %v526_v17 = vld [vmem:[%s3759_s13 + $0x28] sm:$0xff]  ;;  %v544_v19 = vld [vmem:[%s3767_s8 + $0x38] sm:$0xff]  ;;  %v527_v22 = vld [vmem:[%s3759_s13 + $0x30] sm:$0xff] }
  0xdb   : > { %989 = vmatprep.subr.bf16.mxu0 %v2986_v29  ;;  %1102 = vmatprep.subr.bf16.mxu1 %v2988_v30  ;;  %v555_v20 = vpack.c.bf16 %v526_v17, %v525_v16  ;;  %v564_v21 = vpack.c.bf16 %v544_v19, %v543_v18  ;;  %v528_v23 = vld [vmem:[%s3759_s13 + $0x38] sm:$0xff]  ;;  %v545_v24 = vld [vmem:[%s3767_s8 + $0x40] sm:$0xff]  ;;  %v546_v25 = vld [vmem:[%s3767_s8 + $0x48] sm:$0xff] }
  0xdc   : > { %v556_v26 = vpack.c.bf16 %v528_v23, %v527_v22  ;;  %v565_v27 = vpack.c.bf16 %v546_v25, %v545_v24  ;;  %v529_v28 = vld [vmem:[%s3759_s13 + $0x40] sm:$0xff]  ;;  %v530_v29 = vld [vmem:[%s3759_s13 + $0x48] sm:$0xff]  ;;  %v547_v30 = vld [vmem:[%s3767_s8 + $0x50] sm:$0xff] }
  0xdd   : > { %v536_v47 = vld [vmem:[%s3759_s13 + $0x78] sm:$0xff] }
  0xde   : > { %990 = vmatpush1.bf16.msra.mxu0 %v2990_v31  ;;  %1103 = vmatpush1.bf16.msra.mxu1 %v2991_v32  ;;  %v548_v31 = vld [vmem:[%s3767_s8 + $0x58] sm:$0xff]  ;;  %v557_v32 = vpack.c.bf16 %v530_v29, %v529_v28 }
  0xdf   : > { %991 = vmatprep.subr.bf16.mxu0 %v2992_v33  ;;  %1104 = vmatprep.subr.bf16.mxu1 %v2994_v34  ;;  %v566_v33 = vpack.c.bf16 %v548_v31, %v547_v30  ;;  %v531_v34 = vld [vmem:[%s3759_s13 + $0x50] sm:$0xff] }
  0xe2   : > { %992 = vmatpush1.bf16.msra.mxu0 %v2996_v35  ;;  %1105 = vmatpush1.bf16.msra.mxu1 %v2997_v36  ;;  %v532_v35 = vld [vmem:[%s3759_s13 + $0x58] sm:$0xff]  ;;  %v549_v36 = vld [vmem:[%s3767_s8 + $0x60] sm:$0xff] }
  0xe3   : > { %993 = vmatprep.subr.bf16.mxu0 %v2998_v37  ;;  %1106 = vmatprep.subr.bf16.mxu1 %v3000_v38  ;;  %v550_v37 = vld [vmem:[%s3767_s8 + $0x68] sm:$0xff]  ;;  %v558_v38 = vpack.c.bf16 %v532_v35, %v531_v34 }
  0xe6   : > { %994 = vmatpush1.bf16.msra.mxu0 %v3002_v39  ;;  %1107 = vmatpush1.bf16.msra.mxu1 %v3003_v40  ;;  %v567_v39 = vpack.c.bf16 %v550_v37, %v549_v36  ;;  %v533_v40 = vld [vmem:[%s3759_s13 + $0x60] sm:$0xff] }
  0xe7   : > { %995 = vmatprep.subr.bf16.mxu0 %v3004_v41  ;;  %1108 = vmatprep.subr.bf16.mxu1 %v3006_v42  ;;  %v534_v41 = vld [vmem:[%s3759_s13 + $0x68] sm:$0xff]  ;;  %v551_v42 = vld [vmem:[%s3767_s8 + $0x70] sm:$0xff] }
  0xea   : > { %996 = vmatpush1.bf16.msra.mxu0 %v3008_v43  ;;  %1109 = vmatpush1.bf16.msra.mxu1 %v3009_v44  ;;  %v552_v43 = vld [vmem:[%s3767_s8 + $0x78] sm:$0xff]  ;;  %v559_v44 = vpack.c.bf16 %v534_v41, %v533_v40 }
  0xeb   : > { %997 = vmatprep.subr.bf16.mxu0 %v3010_v45  ;;  %1110 = vmatprep.subr.bf16.mxu1 %v3012_v46  ;;  %v568_v45 = vpack.c.bf16 %v552_v43, %v551_v42  ;;  %v535_v46 = vld [vmem:[%s3759_s13 + $0x70] sm:$0xff] }
  0xec   : > { %v560_v48 = vpack.c.bf16 %v536_v47, %v535_v46 }
  0xee   : > { %998 = vmatpush1.bf16.msra.mxu0 %v3014_v49  ;;  %1111 = vmatpush1.bf16.msra.mxu1 %v3015_v50  ;;  %v635_v49 = vlaneseq }
  0xef   : > { %999 = vmatprep.subr.bf16.mxu0 %v3016_v52  ;;  %1112 = vmatprep.subr.bf16.mxu1 %v3018_v53  ;;  %v633_v53 = vld [vmem:[%s4352_s3] sm:$0xf] }
  0xf0   : > { %v636_v50 = vshrl.u32 %v635_v49, 7 }
  0xf2   : > { %1000 = vmatpush1.bf16.msra.mxu0 %v3020_v54  ;;  %1113 = vmatpush1.bf16.msra.mxu1 %v3021_v55  ;;  %v3813_v51 = vsub.s32 0, %v636_v50  ;;  %v645_v52 = vsub.s32 2, %v636_v50  ;;  %v3818_v54 = vsub.s32 1, %v636_v50  ;;  %v649_v55 = vsub.s32 3, %v636_v50 }
  0xf3   : > { %1001 = vmatprep.subr.bf16.mxu0 %v3022_v56  ;;  %1114 = vmatprep.subr.bf16.mxu1 %v3024_v57 }
  0xf4   : > { %v3821_v56 = vrot.slane %v633_v53, %v3813_v51  ;;  %v3823_v57 = vrot.slane %v633_v53, %v645_v52 }
  0xf6   : > { %1002 = vmatpush1.bf16.msra.mxu0 %v3026_v58  ;;  %1115 = vmatpush1.bf16.msra.mxu1 %v3027_v59  ;;  %v1265_v58 = vld [vmem:[%s4353_s4] sm:$0xf]  ;;  %v3829_v59 = vrot.slane %v633_v53, %v3818_v54 }
  0xf7   : > { %1003 = vmatprep.subr.bf16.mxu0 %v3028_v60  ;;  %1116 = vmatprep.subr.bf16.mxu1 %v3030_v61  ;;  %v3831_v60 = vrot.slane %v633_v53, %v649_v55  ;;  %v3838_v4 = vrot.slane %v1265_v58, %v645_v52  ;;  %v3842_v6 = vrot.slane %v1265_v58, %v3818_v54 }
  0xf8   : > { %v3849_v19 = vrot.slane %v1265_v58, %v649_v55 }
  0xfa   : > { %1004 = vmatpush1.bf16.msra.mxu0 %v3032_v62  ;;  %1117 = vmatpush1.bf16.msra.mxu1 %v3033_v63 }
  0xfb   : > { %1005 = vmatprep.subr.bf16.mxu0 %v3034_v0  ;;  %1118 = vmatprep.subr.bf16.mxu1 %v3036_v1  ;;  %v3835_v0 = vrot.slane %v1265_v58, %v3813_v51 }
  0xfe   : > { %1006 = vmatpush1.bf16.msra.mxu0 %v3038_v2  ;;  %1119 = vmatpush1.bf16.msra.mxu1 %v3039_v3 }
 0x101   : > { %1008 = vmatmul.mubr.bf16.vlgmr.msra.gmra.mrb[0].mxu0 %v553_v8  ;;  %1121 = vmatmul.mubr.bf16.vlgmr.msra.gmra.mrb[0].mxu1 %v553_v8 }
 0x102   : > { %1017 = vmatprep.mubr.bf16.mxu0 %v562_v9  ;;  %1130 = vmatprep.mubr.bf16.mxu1 %v562_v9 }
 0x109   : > { %1018 = vmatmul.mubr.bf16.gmra.mrb[4].mxu0 %v554_v14  ;;  %1131 = vmatmul.mubr.bf16.gmra.mrb[4].mxu1 %v554_v14 }
 0x10a   : > { %1027 = vmatprep.mubr.bf16.mxu0 %v563_v15  ;;  %1140 = vmatprep.mubr.bf16.mxu1 %v563_v15 }
 0x111   : > { %1028 = vmatmul.mubr.bf16.gmra.mrb[8].mxu0 %v555_v20  ;;  %1141 = vmatmul.mubr.bf16.gmra.mrb[8].mxu1 %v555_v20 }
 0x112   : > { %1037 = vmatprep.mubr.bf16.mxu0 %v564_v21  ;;  %1150 = vmatprep.mubr.bf16.mxu1 %v564_v21 }
 0x119   : > { %1038 = vmatmul.mubr.bf16.gmra.mrb[12].mxu0 %v556_v26  ;;  %1151 = vmatmul.mubr.bf16.gmra.mrb[12].mxu1 %v556_v26 }
 0x11a   : > { %1047 = vmatprep.mubr.bf16.mxu0 %v565_v27  ;;  %1160 = vmatprep.mubr.bf16.mxu1 %v565_v27 }
 0x121   : > { %1048 = vmatmul.mubr.bf16.gmra.mrb[16].mxu0 %v557_v32  ;;  %1161 = vmatmul.mubr.bf16.gmra.mrb[16].mxu1 %v557_v32 }
 0x122   : > { %1057 = vmatprep.mubr.bf16.mxu0 %v566_v33  ;;  %1170 = vmatprep.mubr.bf16.mxu1 %v566_v33 }
 0x129   : > { %1058 = vmatmul.mubr.bf16.gmra.mrb[20].mxu0 %v558_v38  ;;  %1171 = vmatmul.mubr.bf16.gmra.mrb[20].mxu1 %v558_v38 }
 0x12a   : > { %1067 = vmatprep.mubr.bf16.mxu0 %v567_v39  ;;  %1180 = vmatprep.mubr.bf16.mxu1 %v567_v39 }
 0x131   : > { %1068 = vmatmul.mubr.bf16.gmra.mrb[24].mxu0 %v559_v44  ;;  %1181 = vmatmul.mubr.bf16.gmra.mrb[24].mxu1 %v559_v44 }
 0x132   : > { %1077 = vmatprep.mubr.bf16.mxu0 %v568_v45  ;;  %1190 = vmatprep.mubr.bf16.mxu1 %v568_v45 }
 0x139   : > { %1078 = vmatmul.mubr.bf16.gmra.mrb[28].mxu0 %v560_v48  ;;  %1191 = vmatmul.mubr.bf16.gmra.mrb[28].mxu1 %v560_v48 }
 0x1d4   : > { %v1009_v61 = vpop.f32.mrb[0].mxu0  ;;  %v1122_v62 = vpop.f32.mrb[0].mxu1 }
 0x1d5   : > { %v1010_v63 = vadd.f32 %v1009_v61, %v3821_v56  ;;  %v1123_v1 = vadd.f32 %v1122_v62, %v3823_v57  ;;  %v1011_v2 = vpop.f32.mrb[1].mxu0  ;;  %v1124_v3 = vpop.f32.mrb[1].mxu1 }
 0x1d6   : > { %v1012_v5 = vadd.f32 %v1011_v2, %v3829_v59  ;;  %v1125_v7 = vadd.f32 %v1124_v3, %v3831_v60  ;;  %v1013_v8 = vpop.f32.mrb[2].mxu0  ;;  %v1126_v9 = vpop.f32.mrb[2].mxu1 }
 0x1d7   : > { %v1201_v10 = vmax.f32 %v1010_v63, 0.0  ;;  %v1203_v11 = vmax.f32 %v1123_v1, 0.0  ;;  %v1014_v12 = vadd.f32 %v1013_v8, %v3821_v56  ;;  %v1127_v13 = vadd.f32 %v1126_v9, %v3823_v57  ;;  %v1015_v14 = vpop.f32.mrb[3].mxu0  ;;  %v1128_v15 = vpop.f32.mrb[3].mxu1 }
 0x1d8   : > { %v1202_v16 = vmax.f32 %v1012_v5, 0.0  ;;  %v1016_v17 = vadd.f32 %v1015_v14, %v3829_v59  ;;  %v1129_v18 = vadd.f32 %v1128_v15, %v3831_v60  ;;  %v1204_v21 = vmax.f32 %v1125_v7, 0.0 }
 0x1d9   : > { %v1287_v20 = vmul.f32 %v3835_v0, %v1201_v10  ;;  %v1205_v22 = vmax.f32 %v1014_v12, 0.0  ;;  %v1207_v23 = vmax.f32 %v1127_v13, 0.0  ;;  %v1289_v24 = vmul.f32 %v3838_v4, %v1203_v11 }
 0x1da   : > { %v1288_v25 = vmul.f32 %v3842_v6, %v1202_v16  ;;  %v1206_v26 = vmax.f32 %v1016_v17, 0.0  ;;  %v1208_v28 = vmax.f32 %v1129_v18, 0.0  ;;  %v1290_v37 = vmul.f32 %v3849_v19, %v1204_v21 }
 0x1db   : > { %v1291_v27 = vmul.f32 %v3835_v0, %v1205_v22  ;;  %v1293_v33 = vmul.f32 %v3838_v4, %v1207_v23 }
 0x1dc   : > { %v1292_v29 = vmul.f32 %v3842_v6, %v1206_v26  ;;  %v1019_v30 = vpop.f32.mrb[4].mxu0  ;;  %v1132_v31 = vpop.f32.mrb[4].mxu1  ;;  %v1351_v32 = vadd.f32 %v1288_v25, %v1287_v20  ;;  %v1294_v45 = vmul.f32 %v3849_v19, %v1208_v28 }
 0x1dd   : > { %v1020_v34 = vadd.f32 %v1019_v30, %v3821_v56  ;;  %v1021_v35 = vpop.f32.mrb[5].mxu0  ;;  %v1133_v36 = vadd.f32 %v1132_v31, %v3823_v57  ;;  %v1134_v38 = vpop.f32.mrb[5].mxu1 }
 0x1de   : > { %v1356_v39 = vadd.f32 %v1292_v29, %v1291_v27  ;;  %v1022_v40 = vadd.f32 %v1021_v35, %v3829_v59  ;;  %v1023_v41 = vpop.f32.mrb[6].mxu0  ;;  %v1352_v42 = vadd.f32 %v1351_v32, %v1289_v24  ;;  %v1135_v43 = vadd.f32 %v1134_v38, %v3831_v60  ;;  %v1136_v44 = vpop.f32.mrb[6].mxu1 }
 0x1df   : > { %v1209_v46 = vmax.f32 %v1020_v34, 0.0  ;;  %v1024_v47 = vadd.f32 %v1023_v41, %v3821_v56  ;;  %v1025_v48 = vpop.f32.mrb[7].mxu0  ;;  %v1137_v49 = vadd.f32 %v1136_v44, %v3823_v57  ;;  %v1138_v50 = vpop.f32.mrb[7].mxu1  ;;  %v1211_v53 = vmax.f32 %v1133_v36, 0.0 }
 0x1e0   : > { %v1210_v52 = vmax.f32 %v1022_v40, 0.0  ;;  %v1353_v55 = vadd.f32 %v1352_v42, %v1290_v37  ;;  %v1026_v58 = vadd.f32 %v1025_v48, %v3829_v59  ;;  %v1212_v63 = vmax.f32 %v1135_v43, 0.0 }
 0x1e1   : > { %v1295_v61 = vmul.f32 %v3835_v0, %v1209_v46  ;;  %v1213_v62 = vmax.f32 %v1024_v47, 0.0  ;;  %v1215_v1 = vmax.f32 %v1137_v49, 0.0  ;;  %v1139_v5 = vadd.f32 %v1138_v50, %v3831_v60 }
 0x1e2   : > { %v1296_v2 = vmul.f32 %v3842_v6, %v1210_v52  ;;  %1354 = vadd.xlane.f32.xlu0 %v1353_v55  ;;  %v1214_v3 = vmax.f32 %v1026_v58, 0.0  ;;  %v1357_v7 = vadd.f32 %v1356_v39, %v1293_v33  ;;  %v1297_v9 = vmul.f32 %v3838_v4, %v1211_v53 }
 0x1e3   : > { %v1299_v8 = vmul.f32 %v3835_v0, %v1213_v62  ;;  %v1301_v17 = vmul.f32 %v3838_v4, %v1215_v1  ;;  %v1216_v18 = vmax.f32 %v1139_v5, 0.0  ;;  %v1298_v27 = vmul.f32 %v3849_v19, %v1212_v63 }
 0x1e4   : > { %v1300_v10 = vmul.f32 %v3842_v6, %v1214_v3  ;;  %v1029_v11 = vpop.f32.mrb[8].mxu0  ;;  %v1358_v12 = vadd.f32 %v1357_v7, %v1294_v45  ;;  %v1142_v13 = vpop.f32.mrb[8].mxu1  ;;  %v1361_v14 = vadd.f32 %v1296_v2, %v1295_v61 }
 0x1e5   : > { %v1030_v15 = vadd.f32 %v1029_v11, %v3821_v56  ;;  %v1031_v16 = vpop.f32.mrb[9].mxu0  ;;  %v1143_v20 = vadd.f32 %v1142_v13, %v3823_v57  ;;  %v1144_v21 = vpop.f32.mrb[9].mxu1  ;;  %v1302_v40 = vmul.f32 %v3849_v19, %v1216_v18 }
 0x1e6   : > { %v1366_v22 = vadd.f32 %v1300_v10, %v1299_v8  ;;  %v1032_v23 = vadd.f32 %v1031_v16, %v3829_v59  ;;  %v1033_v24 = vpop.f32.mrb[10].mxu0  ;;  %1359 = vadd.xlane.f32.xlu0 %v1358_v12  ;;  %v1145_v25 = vadd.f32 %v1144_v21, %v3831_v60  ;;  %v1146_v26 = vpop.f32.mrb[10].mxu1  ;;  %v1362_v47 = vadd.f32 %v1361_v14, %v1297_v9 }
 0x1e7   : > { %v1217_v28 = vmax.f32 %v1030_v15, 0.0  ;;  %v1034_v29 = vadd.f32 %v1033_v24, %v3821_v56  ;;  %v1035_v30 = vpop.f32.mrb[11].mxu0  ;;  %v1219_v31 = vmax.f32 %v1143_v20, 0.0  ;;  %v1147_v32 = vadd.f32 %v1146_v26, %v3823_v57  ;;  %v1148_v33 = vpop.f32.mrb[11].mxu1 }
 0x1e8   : > { %v1218_v34 = vmax.f32 %v1032_v23, 0.0  ;;  %v1036_v35 = vadd.f32 %v1035_v30, %v3829_v59  ;;  %v1220_v36 = vmax.f32 %v1145_v25, 0.0  ;;  %v1149_v37 = vadd.f32 %v1148_v33, %v3831_v60 }
 0x1e9   : > { %v1303_v38 = vmul.f32 %v3835_v0, %v1217_v28  ;;  %v1221_v39 = vmax.f32 %v1034_v29, 0.0  ;;  %v1223_v41 = vmax.f32 %v1147_v32, 0.0  ;;  %v1305_v44 = vmul.f32 %v3838_v4, %v1219_v31 }
 0x1ea   : > { %v1304_v42 = vmul.f32 %v3842_v6, %v1218_v34  ;;  %v1222_v43 = vmax.f32 %v1036_v35, 0.0  ;;  %v1306_v46 = vmul.f32 %v3849_v19, %v1220_v36  ;;  %v1367_v48 = vadd.f32 %v1366_v22, %v1301_v17 }
 0x1eb   : > { %v1307_v45 = vmul.f32 %v3835_v0, %v1221_v39  ;;  %v1309_v52 = vmul.f32 %v3838_v4, %v1223_v41  ;;  %v1224_v53 = vmax.f32 %v1149_v37, 0.0  ;;  %v1363_v62 = vadd.f32 %v1362_v47, %v1298_v27 }
 0x1ec   : > { %v1371_v49 = vadd.f32 %v1304_v42, %v1303_v38  ;;  %v1308_v50 = vmul.f32 %v3842_v6, %v1222_v43  ;;  %v1039_v55 = vpop.f32.mrb[12].mxu0  ;;  %v1152_v58 = vpop.f32.mrb[12].mxu1  ;;  %v1368_v3 = vadd.f32 %v1367_v48, %v1302_v40 }
 0x1ed   : > { %v1040_v61 = vadd.f32 %v1039_v55, %v3821_v56  ;;  %v1041_v63 = vpop.f32.mrb[13].mxu0  ;;  %v1153_v1 = vadd.f32 %v1152_v58, %v3823_v57  ;;  %v1154_v2 = vpop.f32.mrb[13].mxu1  ;;  %1364 = vadd.xlane.f32.xlu1 %v1363_v62  ;;  %v1310_v23 = vmul.f32 %v3849_v19, %v1224_v53 }
 0x1ee   : > { %v1376_v5 = vadd.f32 %v1308_v50, %v1307_v45  ;;  %v1042_v7 = vadd.f32 %v1041_v63, %v3829_v59  ;;  %v1043_v8 = vpop.f32.mrb[14].mxu0  ;;  %v1155_v9 = vadd.f32 %v1154_v2, %v3831_v60  ;;  %v1156_v10 = vpop.f32.mrb[14].mxu1  ;;  %v1372_v11 = vadd.f32 %v1371_v49, %v1305_v44 }
 0x1ef   : > { %v1225_v12 = vmax.f32 %v1040_v61, 0.0  ;;  %v1044_v13 = vadd.f32 %v1043_v8, %v3821_v56  ;;  %v1045_v14 = vpop.f32.mrb[15].mxu0  ;;  %v1227_v15 = vmax.f32 %v1153_v1, 0.0  ;;  %v1157_v16 = vadd.f32 %v1156_v10, %v3823_v57  ;;  %v1158_v17 = vpop.f32.mrb[15].mxu1 }
 0x1f0   : > { %v1226_v18 = vmax.f32 %v1042_v7, 0.0  ;;  %v1046_v20 = vadd.f32 %v1045_v14, %v3829_v59  ;;  %v1228_v21 = vmax.f32 %v1155_v9, 0.0  ;;  %v1159_v22 = vadd.f32 %v1158_v17, %v3831_v60 }
 0x1f1   : > { %v1311_v24 = vmul.f32 %v3835_v0, %v1225_v12  ;;  %v1229_v25 = vmax.f32 %v1044_v13, 0.0  ;;  %v1231_v26 = vmax.f32 %v1157_v16, 0.0  ;;  %v1313_v29 = vmul.f32 %v3838_v4, %v1227_v15  ;;  %1369 = vadd.xlane.f32.xlu1 %v1368_v3 }
 0x1f2   : > { %v1312_v27 = vmul.f32 %v3842_v6, %v1226_v18  ;;  %v1230_v28 = vmax.f32 %v1046_v20, 0.0  ;;  %v1377_v31 = vadd.f32 %v1376_v5, %v1309_v52  ;;  %v1373_v32 = vadd.f32 %v1372_v11, %v1306_v46 }
 0x1f3   : > { %v1315_v30 = vmul.f32 %v3835_v0, %v1229_v25  ;;  %v1314_v35 = vmul.f32 %v3849_v19, %v1228_v21  ;;  %v1232_v36 = vmax.f32 %v1159_v22, 0.0  ;;  %v1317_v39 = vmul.f32 %v3838_v4, %v1231_v26 }
 0x1f4   : > { %v1381_v33 = vadd.f32 %v1312_v27, %v1311_v24  ;;  %v1316_v34 = vmul.f32 %v3842_v6, %v1230_v28  ;;  %v1049_v37 = vpop.f32.mrb[16].mxu0  ;;  %v1162_v38 = vpop.f32.mrb[16].mxu1  ;;  %v1378_v41 = vadd.f32 %v1377_v31, %v1310_v23  ;;  %1374 = vadd.xlane.f32.xlu0 %v1373_v32 }
 0x1f5   : > { %v1050_v40 = vadd.f32 %v1049_v37, %v3821_v56  ;;  %v1051_v42 = vpop.f32.mrb[17].mxu0  ;;  %v1163_v43 = vadd.f32 %v1162_v38, %v3823_v57  ;;  %v1164_v44 = vpop.f32.mrb[17].mxu1  ;;  %v1318_v5 = vmul.f32 %v3849_v19, %v1232_v36 }
 0x1f6   : > { %v1386_v45 = vadd.f32 %v1316_v34, %v1315_v30  ;;  %v1052_v46 = vadd.f32 %v1051_v42, %v3829_v59  ;;  %v1053_v47 = vpop.f32.mrb[18].mxu0  ;;  %v1165_v48 = vadd.f32 %v1164_v44, %v3831_v60  ;;  %v1166_v49 = vpop.f32.mrb[18].mxu1  ;;  %v1382_v50 = vadd.f32 %v1381_v33, %v1313_v29  ;;  %1379 = vadd.xlane.f32.xlu1 %v1378_v41 }
 0x1f7   : > { %v1233_v52 = vmax.f32 %v1050_v40, 0.0  ;;  %v1054_v53 = vadd.f32 %v1053_v47, %v3821_v56  ;;  %v1055_v55 = vpop.f32.mrb[19].mxu0  ;;  %v1235_v58 = vmax.f32 %v1163_v43, 0.0  ;;  %v1167_v61 = vadd.f32 %v1166_v49, %v3823_v57  ;;  %v1168_v62 = vpop.f32.mrb[19].mxu1 }
 0x1f8   : > { %v1234_v63 = vmax.f32 %v1052_v46, 0.0  ;;  %v1056_v1 = vadd.f32 %v1055_v55, %v3829_v59  ;;  %v1236_v2 = vmax.f32 %v1165_v48, 0.0  ;;  %v1169_v3 = vadd.f32 %v1168_v62, %v3831_v60 }
 0x1f9   : > { %v1319_v7 = vmul.f32 %v3835_v0, %v1233_v52  ;;  %v1237_v8 = vmax.f32 %v1054_v53, 0.0  ;;  %v1239_v9 = vmax.f32 %v1167_v61, 0.0  ;;  %v1321_v12 = vmul.f32 %v3838_v4, %v1235_v58 }
 0x1fa   : > { %v1320_v10 = vmul.f32 %v3842_v6, %v1234_v63  ;;  %v1238_v11 = vmax.f32 %v1056_v1, 0.0  ;;  %v1387_v14 = vadd.f32 %v1386_v45, %v1317_v39  ;;  %v1383_v15 = vadd.f32 %v1382_v50, %v1314_v35 }
 0x1fb   : > { %v1323_v13 = vmul.f32 %v3835_v0, %v1237_v8  ;;  %v1322_v18 = vmul.f32 %v3849_v19, %v1236_v2  ;;  %v1240_v20 = vmax.f32 %v1169_v3, 0.0  ;;  %v1325_v23 = vmul.f32 %v3838_v4, %v1239_v9 }
 0x1fc   : > { %v1391_v16 = vadd.f32 %v1320_v10, %v1319_v7  ;;  %v1324_v17 = vmul.f32 %v3842_v6, %v1238_v11  ;;  %v1059_v21 = vpop.f32.mrb[20].mxu0  ;;  %v1172_v22 = vpop.f32.mrb[20].mxu1  ;;  %v1388_v25 = vadd.f32 %v1387_v14, %v1318_v5  ;;  %1384 = vadd.xlane.f32.xlu0 %v1383_v15 }
 0x1fd   : > { %v1060_v24 = vadd.f32 %v1059_v21, %v3821_v56  ;;  %v1061_v26 = vpop.f32.mrb[21].mxu0  ;;  %v1173_v27 = vadd.f32 %v1172_v22, %v3823_v57  ;;  %v1174_v28 = vpop.f32.mrb[21].mxu1  ;;  %v1326_v45 = vmul.f32 %v3849_v19, %v1240_v20 }
 0x1fe   : > { %v1396_v29 = vadd.f32 %v1324_v17, %v1323_v13  ;;  %v1062_v30 = vadd.f32 %v1061_v26, %v3829_v59  ;;  %v1063_v31 = vpop.f32.mrb[22].mxu0  ;;  %v1175_v32 = vadd.f32 %v1174_v28, %v3831_v60  ;;  %v1176_v33 = vpop.f32.mrb[22].mxu1  ;;  %v1392_v34 = vadd.f32 %v1391_v16, %v1321_v12  ;;  %1389 = vadd.xlane.f32.xlu1 %v1388_v25 }
 0x1ff   : > { %v1241_v35 = vmax.f32 %v1060_v24, 0.0  ;;  %v1064_v36 = vadd.f32 %v1063_v31, %v3821_v56  ;;  %v1065_v37 = vpop.f32.mrb[23].mxu0  ;;  %v1243_v38 = vmax.f32 %v1173_v27, 0.0  ;;  %v1177_v39 = vadd.f32 %v1176_v33, %v3823_v57  ;;  %v1178_v40 = vpop.f32.mrb[23].mxu1 }
 0x200   : > { %v1242_v41 = vmax.f32 %v1062_v30, 0.0  ;;  %v1066_v42 = vadd.f32 %v1065_v37, %v3829_v59  ;;  %v1244_v43 = vmax.f32 %v1175_v32, 0.0  ;;  %v1179_v44 = vadd.f32 %v1178_v40, %v3831_v60 }
 0x201   : > { %v1327_v46 = vmul.f32 %v3835_v0, %v1241_v35  ;;  %v1245_v47 = vmax.f32 %v1064_v36, 0.0  ;;  %v1247_v48 = vmax.f32 %v1177_v39, 0.0  ;;  %v1329_v52 = vmul.f32 %v3838_v4, %v1243_v38 }
 0x202   : > { %v1328_v49 = vmul.f32 %v3842_v6, %v1242_v41  ;;  %v1246_v50 = vmax.f32 %v1066_v42, 0.0  ;;  %v1397_v55 = vadd.f32 %v1396_v29, %v1325_v23  ;;  %v1393_v58 = vadd.f32 %v1392_v34, %v1322_v18 }
 0x203   : > { %v1331_v53 = vmul.f32 %v3835_v0, %v1245_v47  ;;  %v1330_v63 = vmul.f32 %v3849_v19, %v1244_v43  ;;  %v1248_v1 = vmax.f32 %v1179_v44, 0.0  ;;  %v1333_v5 = vmul.f32 %v3838_v4, %v1247_v48 }
 0x204   : > { %v1401_v61 = vadd.f32 %v1328_v49, %v1327_v46  ;;  %v1332_v62 = vmul.f32 %v3842_v6, %v1246_v50  ;;  %v1069_v2 = vpop.f32.mrb[24].mxu0  ;;  %v1182_v3 = vpop.f32.mrb[24].mxu1  ;;  %v1398_v8 = vadd.f32 %v1397_v55, %v1326_v45  ;;  %1394 = vadd.xlane.f32.xlu0 %v1393_v58 }
 0x205   : > { %v1070_v7 = vadd.f32 %v1069_v2, %v3821_v56  ;;  %v1071_v9 = vpop.f32.mrb[25].mxu0  ;;  %v1183_v10 = vadd.f32 %v1182_v3, %v3823_v57  ;;  %v1184_v11 = vpop.f32.mrb[25].mxu1  ;;  %v1334_v29 = vmul.f32 %v3849_v19, %v1248_v1 }
 0x206   : > { %v1406_v12 = vadd.f32 %v1332_v62, %v1331_v53  ;;  %v1072_v13 = vadd.f32 %v1071_v9, %v3829_v59  ;;  %v1073_v14 = vpop.f32.mrb[26].mxu0  ;;  %v1185_v15 = vadd.f32 %v1184_v11, %v3831_v60  ;;  %v1186_v16 = vpop.f32.mrb[26].mxu1  ;;  %v1402_v17 = vadd.f32 %v1401_v61, %v1329_v52  ;;  %1399 = vadd.xlane.f32.xlu1 %v1398_v8 }
 0x207   : > { %v1249_v18 = vmax.f32 %v1070_v7, 0.0  ;;  %v1074_v20 = vadd.f32 %v1073_v14, %v3821_v56  ;;  %v1075_v21 = vpop.f32.mrb[27].mxu0  ;;  %v1251_v22 = vmax.f32 %v1183_v10, 0.0  ;;  %v1187_v23 = vadd.f32 %v1186_v16, %v3823_v57  ;;  %v1188_v24 = vpop.f32.mrb[27].mxu1 }
 0x208   : > { %v1250_v25 = vmax.f32 %v1072_v13, 0.0  ;;  %v1076_v26 = vadd.f32 %v1075_v21, %v3829_v59  ;;  %v1252_v27 = vmax.f32 %v1185_v15, 0.0  ;;  %v1189_v28 = vadd.f32 %v1188_v24, %v3831_v60 }
 0x209   : > { %v1335_v30 = vmul.f32 %v3835_v0, %v1249_v18  ;;  %v1253_v31 = vmax.f32 %v1074_v20, 0.0  ;;  %v1255_v32 = vmax.f32 %v1187_v23, 0.0  ;;  %v1337_v35 = vmul.f32 %v3838_v4, %v1251_v22 }
 0x20a   : > { %v1336_v33 = vmul.f32 %v3842_v6, %v1250_v25  ;;  %v1254_v34 = vmax.f32 %v1076_v26, 0.0  ;;  %v1407_v37 = vadd.f32 %v1406_v12, %v1333_v5  ;;  %v1403_v38 = vadd.f32 %v1402_v17, %v1330_v63 }
 0x20b   : > { %v1339_v36 = vmul.f32 %v3835_v0, %v1253_v31  ;;  %v1338_v41 = vmul.f32 %v3849_v19, %v1252_v27  ;;  %v1256_v42 = vmax.f32 %v1189_v28, 0.0  ;;  %v1341_v45 = vmul.f32 %v3838_v4, %v1255_v32 }
 0x20c   : > { %v1411_v39 = vadd.f32 %v1336_v33, %v1335_v30  ;;  %v1340_v40 = vmul.f32 %v3842_v6, %v1254_v34  ;;  %v1079_v43 = vpop.f32.mrb[28].mxu0  ;;  %v1192_v44 = vpop.f32.mrb[28].mxu1  ;;  %v1408_v47 = vadd.f32 %v1407_v37, %v1334_v29  ;;  %1404 = vadd.xlane.f32.xlu0 %v1403_v38  ;;  %v3443_v25 = vmov 0  }
 0x20d   : > { %v1080_v46 = vadd.f32 %v1079_v43, %v3821_v56  ;;  %v1081_v48 = vpop.f32.mrb[29].mxu0  ;;  %v1193_v49 = vadd.f32 %v1192_v44, %v3823_v57  ;;  %v1194_v50 = vpop.f32.mrb[29].mxu1  ;;  %v1342_v12 = vmul.f32 %v3849_v19, %v1256_v42  ;;  %2943 = vset.pattern.permute.xlu1 %v3443_v25  ;;  %2942 = vset.pattern.permute.xlu0 %v3443_v25 }
 0x20e   : > { %v1416_v52 = vadd.f32 %v1340_v40, %v1339_v36  ;;  %v1082_v53 = vadd.f32 %v1081_v48, %v3829_v59  ;;  %v1083_v55 = vpop.f32.mrb[30].mxu0  ;;  %v1195_v58 = vadd.f32 %v1194_v50, %v3831_v60  ;;  %v1196_v61 = vpop.f32.mrb[30].mxu1  ;;  %v1412_v62 = vadd.f32 %v1411_v39, %v1337_v35  ;;  %1409 = vadd.xlane.f32.xlu1 %v1408_v47 }
 0x20f   : > { %v1257_v63 = vmax.f32 %v1080_v46, 0.0  ;;  %v1084_v1 = vadd.f32 %v1083_v55, %v3821_v56  ;;  %v1085_v2 = vpop.f32.mrb[31].mxu0  ;;  %v1259_v3 = vmax.f32 %v1193_v49, 0.0  ;;  %v1197_v5 = vadd.f32 %v1196_v61, %v3823_v57  ;;  %v1198_v7 = vpop.f32.mrb[31].mxu1  ;;  %2145 = vmatprep.mubr.bf16.mxu0 %v3443_v25 }
 0x210   : > { %v1258_v8 = vmax.f32 %v1082_v53, 0.0  ;;  %v1086_v9 = vadd.f32 %v1085_v2, %v3829_v59  ;;  %v1260_v10 = vmax.f32 %v1195_v58, 0.0  ;;  %v1199_v11 = vadd.f32 %v1198_v7, %v3831_v60 }
 0x211   : > { %v1343_v13 = vmul.f32 %v3835_v0, %v1257_v63  ;;  %v1261_v14 = vmax.f32 %v1084_v1, 0.0  ;;  %v1263_v15 = vmax.f32 %v1197_v5, 0.0  ;;  %v1345_v17 = vmul.f32 %v3838_v4, %v1259_v3 }
 0x212   : > { %v1344_v16 = vmul.f32 %v3842_v6, %v1258_v8  ;;  %v1262_v56 = vmax.f32 %v1086_v9, 0.0  ;;  %v1264_v18 = vmax.f32 %v1199_v11, 0.0  ;;  %v1346_v20 = vmul.f32 %v3849_v19, %v1260_v10 }
 0x213   : > { %v1347_v57 = vmul.f32 %v3835_v0, %v1261_v14  ;;  %v1417_v59 = vadd.f32 %v1416_v52, %v1341_v45  ;;  %v1413_v21 = vadd.f32 %v1412_v62, %v1338_v41  ;;  %v1349_v23 = vmul.f32 %v3838_v4, %v1263_v15  ;;  %v3974_v4 = vld [vmem:[#allocation2] ss:$0 sm:$0xff] }
 0x214   : > { %v1421_v22 = vadd.f32 %v1344_v16, %v1343_v13  ;;  %v1348_v60 = vmul.f32 %v3842_v6, %v1262_v56  ;;  %v1350_v27 = vmul.f32 %v3849_v19, %v1264_v18 }
 0x215   : > { %v1418_v24 = vadd.f32 %v1417_v59, %v1342_v12  ;;  %1414 = vadd.xlane.f32.xlu0 %v1413_v21 }
 0x216   : > { %v1426_v26 = vadd.f32 %v1348_v60, %v1347_v57  ;;  %v1422_v28 = vadd.f32 %v1421_v22, %v1345_v17 }
 0x217   : > { %1419 = vadd.xlane.f32.xlu1 %v1418_v24 }
 0x218   : > { %v1427_v0 = vadd.f32 %v1426_v26, %v1349_v23  ;;  %v1423_v29 = vadd.f32 %v1422_v28, %v1346_v20 }
 0x21a   : > { %v1428_v30 = vadd.f32 %v1427_v0, %v1350_v27  ;;  %1424 = vadd.xlane.f32.xlu0 %v1423_v29 }
 0x21c   : > { %1429 = vadd.xlane.f32.xlu1 %v1428_v30 }
 0x26f   : > { %v1355_v6 = vpop.xlane.xlu0 %1354 }
 0x270   : > { %v1438_v31 = vadd.f32 %v3974_v4, %v1355_v6 }
 0x272   : > { %v1454_v32 = vsub.f32 0.0, %v1438_v31 }
 0x273   : > { %v1360_v33 = vpop.xlane.xlu0 %1359 }
 0x274   : > { %v1470_v34 = vmul.f32 1.442695, %v1454_v32  ;;  %v1439_v19 = vadd.f32 %v3974_v4, %v1360_v33 }
 0x276   : > { %3080 = vpow2.f32 %v1470_v34  ;;  %v1455_v35 = vsub.f32 0.0, %v1439_v19 }
 0x278   : > { %v1472_v36 = vmul.f32 1.442695, %v1455_v35 }
 0x27a   : > { %3082 = vpow2.f32 %v1472_v36  ;;  %v1365_v37 = vpop.xlane.xlu1 %1364 }
 0x27b   : > { %v1440_v38 = vadd.f32 %v3974_v4, %v1365_v37 }
 0x27d   : > { %v1456_v39 = vsub.f32 0.0, %v1440_v38 }
 0x27e   : > { %v1370_v41 = vpop.xlane.xlu1 %1369 }
 0x27f   : > { %v1474_v43 = vmul.f32 1.442695, %v1456_v39  ;;  %v1441_v44 = vadd.f32 %v3974_v4, %v1370_v41 }
 0x280   : > { %v3081_v40 = vpop.eup %3080 }
 0x281   : > { %v1502_v42 = vadd.f32 1.0, %v3081_v40  ;;  %v1375_v45 = vpop.xlane.xlu0 %1374  ;;  %v1457_v46 = vsub.f32 0.0, %v1441_v44 }
 0x282   : > { %v1442_v49 = vadd.f32 %v3974_v4, %v1375_v45 }
 0x283   : > { %3084 = vrcp.f32 %v1502_v42  ;;  %v1380_v48 = vpop.xlane.xlu1 %1379  ;;  %v1476_v52 = vmul.f32 1.442695, %v1457_v46 }
 0x284   : > { %v3083_v47 = vpop.eup %3082  ;;  %3086 = vpow2.f32 %v1474_v43  ;;  %v1443_v53 = vadd.f32 %v3974_v4, %v1380_v48  ;;  %v1458_v58 = vsub.f32 0.0, %v1442_v49 }
 0x285   : > { %v1503_v50 = vadd.f32 1.0, %v3083_v47 }
 0x286   : > { %v1459_v55 = vsub.f32 0.0, %v1443_v53  ;;  %v1478_v2 = vmul.f32 1.442695, %v1458_v58 }
 0x287   : > { %3088 = vrcp.f32 %v1503_v50 }
 0x288   : > { %3090 = vpow2.f32 %v1476_v52  ;;  %v1480_v61 = vmul.f32 1.442695, %v1459_v55 }
 0x289   : > { %v1385_v62 = vpop.xlane.xlu0 %1384 }
 0x28a   : > { %3092 = vpow2.f32 %v1480_v61  ;;  %v1444_v63 = vadd.f32 %v3974_v4, %v1385_v62 }
 0x28b   : > { %v1390_v1 = vpop.xlane.xlu1 %1389  ;;  %3094 = vpow2.f32 %v1478_v2 }
 0x28c   : > { %v1445_v5 = vadd.f32 %v3974_v4, %v1390_v1  ;;  %v1460_v8 = vsub.f32 0.0, %v1444_v63 }
 0x28d   : > { %v3085_v3 = vpop.eup %3084 }
 0x28e   : > { %v3087_v7 = vpop.eup %3086  ;;  %1568 = vperm.xlu0 %2942, %v3085_v3   ;;  %v1461_v10 = vsub.f32 0.0, %v1445_v5  ;;  %v1482_v14 = vmul.f32 1.442695, %v1460_v8  ;;  %v1550_v17 = vsub.f32 1.0, %v3085_v3 }
 0x28f   : > { %v1504_v9 = vadd.f32 1.0, %v3087_v7 }
 0x290   : > { %v1484_v12 = vmul.f32 1.442695, %v1461_v10 }
 0x291   : > { %v3089_v11 = vpop.eup %3088  ;;  %3096 = vrcp.f32 %v1504_v9  ;;  %v1395_v16 = vpop.xlane.xlu0 %1394 }
 0x292   : > { %v3091_v13 = vpop.eup %3090  ;;  %1573 = vperm.xlu1 %2943, %v3089_v11   ;;  %3098 = vpow2.f32 %v1484_v12  ;;  %v1446_v59 = vadd.f32 %v3974_v4, %v1395_v16  ;;  %v1551_v22 = vsub.f32 1.0, %v3089_v11 }
 0x293   : > { %v1505_v15 = vadd.f32 1.0, %v3091_v13  ;;  %v1400_v56 = vpop.xlane.xlu1 %1399  ;;  %3100 = vpow2.f32 %v1482_v14 }
 0x294   : > { %v3093_v18 = vpop.eup %3092  ;;  %v1447_v57 = vadd.f32 %v3974_v4, %v1400_v56  ;;  %v1462_v24 = vsub.f32 0.0, %v1446_v59 }
 0x295   : > { %v1507_v20 = vadd.f32 1.0, %v3093_v18  ;;  %3102 = vrcp.f32 %v1505_v15  ;;  %v3095_v23 = vpop.eup %3094 }
 0x296   : > { %1664 = vperm.xlu1 %2943, %v1550_v17   ;;  %v1463_v21 = vsub.f32 0.0, %v1447_v57  ;;  %v1506_v29 = vadd.f32 1.0, %v3095_v23  ;;  %v1486_v31 = vmul.f32 1.442695, %v1462_v24 }
 0x297   : > { %3104 = vrcp.f32 %v1507_v20 }
 0x298   : > { %v1488_v60 = vmul.f32 1.442695, %v1463_v21 }
 0x299   : > { %v1405_v26 = vpop.xlane.xlu0 %1404 }
 0x29a   : > { %1669 = vperm.xlu1 %2943, %v1551_v22   ;;  %3106 = vpow2.f32 %v1488_v60  ;;  %v1448_v32 = vadd.f32 %v3974_v4, %v1405_v26 }
 0x29b   : > { %v3097_v27 = vpop.eup %3096  ;;  %v1410_v28 = vpop.xlane.xlu1 %1409 }
 0x29c   : > { %v3099_v0 = vpop.eup %3098  ;;  %v1449_v30 = vadd.f32 %v3974_v4, %v1410_v28  ;;  %v1464_v37 = vsub.f32 0.0, %v1448_v32  ;;  %v1552_v41 = vsub.f32 1.0, %v3097_v27 }
 0x29d   : > { %v1509_v6 = vadd.f32 1.0, %v3099_v0  ;;  %v3101_v34 = vpop.eup %3100 }
 0x29e   : > { %1578 = vperm.xlu1 %2943, %v3097_v27   ;;  %v1465_v33 = vsub.f32 0.0, %v1449_v30  ;;  %v1508_v43 = vadd.f32 1.0, %v3101_v34  ;;  %v1490_v46 = vmul.f32 1.442695, %v1464_v37 }
 0x29f   : > { %3108 = vrcp.f32 %v1509_v6  ;;  %v3103_v19 = vpop.eup %3102 }
 0x2a0   : > { %3110 = vrcp.f32 %v1506_v29  ;;  %v1492_v35 = vmul.f32 1.442695, %v1465_v33  ;;  %v1553_v49 = vsub.f32 1.0, %v3103_v19 }
 0x2a1   : > { %v3105_v36 = vpop.eup %3104  ;;  %3112 = vpow2.f32 %v1486_v31 }
 0x2a2   : > { %1583 = vperm.xlu1 %2943, %v3103_v19   ;;  %3114 = vpow2.f32 %v1492_v35  ;;  %1593 = vperm.xlu0 %2942, %v3105_v36   ;;  %v1555_v38 = vsub.f32 1.0, %v3105_v36  ;;  %v1415_v39 = vpop.xlane.xlu0 %1414 }
 0x2a3   : > { %v1450_v47 = vadd.f32 %v3974_v4, %v1415_v39  ;;  %v3176_v39 = vld [vmem:[%s3759_s13] sm:$0xff] }
 0x2a4   : > { %v1420_v40 = vpop.xlane.xlu1 %1419  ;;  %v3107_v42 = vpop.eup %3106 }
 0x2a5   : > { %v1451_v44 = vadd.f32 %v3974_v4, %v1420_v40  ;;  %v1511_v45 = vadd.f32 1.0, %v3107_v42  ;;  %v1466_v58 = vsub.f32 0.0, %v1450_v47  ;;  %v3179_v47 = vld [vmem:[%s3767_s8 + $0x8] sm:$0xff] }
 0x2a6   : > { %1674 = vperm.xlu1 %2943, %v1552_v41   ;;  %1689 = vperm.xlu0 %2942, %v1555_v38   ;;  %v3177_v41 = vld [vmem:[%s3767_s8] sm:$0xff] }
 0x2a7   : > { %v1467_v48 = vsub.f32 0.0, %v1451_v44  ;;  %3116 = vrcp.f32 %v1511_v45  ;;  %v1425_v63 = vpop.xlane.xlu0 %1424  ;;  %v1494_v8 = vmul.f32 1.442695, %v1466_v58  ;;  %v3178_v45 = vld [vmem:[%s3759_s13 + $0x8] sm:$0xff]  ;;  %v3180_v58 = vld [vmem:[%s3759_s13 + $0x10] sm:$0xff] }
 0x2a8   : > { %3118 = vrcp.f32 %v1508_v43  ;;  %v1452_v9 = vadd.f32 %v3974_v4, %v1425_v63  ;;  %v3181_v63 = vld [vmem:[%s3767_s8 + $0x10] sm:$0xff] }
 0x2a9   : > { %v1496_v50 = vmul.f32 1.442695, %v1467_v48  ;;  %v1430_v52 = vpop.xlane.xlu1 %1429  ;;  %v3109_v53 = vpop.eup %3108  ;;  %3120 = vpow2.f32 %v1490_v46 }
 0x2aa   : > { %v1453_v55 = vadd.f32 %v3974_v4, %v1430_v52  ;;  %1679 = vperm.xlu1 %2943, %v1553_v49   ;;  %v3111_v61 = vpop.eup %3110  ;;  %1603 = vperm.xlu0 %2942, %v3109_v53   ;;  %v1557_v62 = vsub.f32 1.0, %v3109_v53  ;;  %v1468_v13 = vsub.f32 0.0, %v1452_v9  ;;  %v3183_v9 = vld [vmem:[%s3767_s8 + $0x18] sm:$0xff] }
 0x2ab   : > { %3122 = vpow2.f32 %v1496_v50  ;;  %v3113_v1 = vpop.eup %3112  ;;  %v1554_v11 = vsub.f32 1.0, %v3111_v61 }
 0x2ac   : > { %v1469_v2 = vsub.f32 0.0, %v1453_v55  ;;  %v3115_v3 = vpop.eup %3114  ;;  %v1510_v10 = vadd.f32 1.0, %v3113_v1  ;;  %v1498_v18 = vmul.f32 1.442695, %v1468_v13 }
 0x2ad   : > { %v1513_v5 = vadd.f32 1.0, %v3115_v3 }
 0x2ae   : > { %v1500_v7 = vmul.f32 1.442695, %v1469_v2  ;;  %1588 = vperm.xlu1 %2943, %v3111_v61   ;;  %1699 = vperm.xlu0 %2942, %v1557_v62  }
 0x2af   : > { %3124 = vrcp.f32 %v1513_v5  ;;  %v3182_v5 = vld [vmem:[%s3759_s13 + $0x18] sm:$0xff] }
 0x2b0   : > { %3126 = vpow2.f32 %v1500_v7 }
 0x2b1   : > { %v3117_v12 = vpop.eup %3116  ;;  %3128 = vpow2.f32 %v1494_v8 }
 0x2b2   : > { %1684 = vperm.xlu1 %2943, %v1554_v11   ;;  %v3119_v14 = vpop.eup %3118  ;;  %3130 = vrcp.f32 %v1510_v10  ;;  %1613 = vperm.xlu0 %2942, %v3117_v12   ;;  %v1559_v15 = vsub.f32 1.0, %v3117_v12  ;;  %v3184_v11 = vld [vmem:[%s3767_s8 + $0x28] sm:$0xff] }
 0x2b3   : > { %v3121_v16 = vpop.eup %3120  ;;  %v1556_v4 = vsub.f32 1.0, %v3119_v14 }
 0x2b4   : > { %v1512_v57 = vadd.f32 1.0, %v3121_v16 }
 0x2b5   : > { %v3123_v56 = vpop.eup %3122 }
 0x2b6   : > { %v1515_v17 = vadd.f32 1.0, %v3123_v56  ;;  %1598 = vperm.xlu1 %2943, %v3119_v14   ;;  %1709 = vperm.xlu0 %2942, %v1559_v15   ;;  %v3185_v15 = vld [vmem:[%s3759_s13 + $0x28] sm:$0xff] }
 0x2b8   : > { %3132 = vrcp.f32 %v1515_v17  ;;  %v3186_v17 = vld [vmem:[%s3767_s8 + $0x38] sm:$0xff] }
 0x2b9   : > { %v3125_v20 = vpop.eup %3124  ;;  %3134 = vpow2.f32 %v1498_v18 }
 0x2ba   : > { %1694 = vperm.xlu1 %2943, %v1556_v4   ;;  %v3127_v59 = vpop.eup %3126  ;;  %3136 = vrcp.f32 %v1512_v57  ;;  %1623 = vperm.xlu0 %2942, %v3125_v20   ;;  %v1561_v21 = vsub.f32 1.0, %v3125_v20  ;;  %v3187_v20 = vld [vmem:[%s3759_s13 + $0x38] sm:$0xff] }
 0x2bb   : > { %v3129_v22 = vpop.eup %3128  ;;  %v1517_v60 = vadd.f32 1.0, %v3127_v59 }
 0x2bc   : > { %v3131_v23 = vpop.eup %3130  ;;  %v1514_v24 = vadd.f32 1.0, %v3129_v22 }
 0x2bd   : > { %3138 = vrcp.f32 %v1517_v60  ;;  %v1558_v26 = vsub.f32 1.0, %v3131_v23 }
 0x2be   : > { %1608 = vperm.xlu1 %2943, %v3131_v23   ;;  %1719 = vperm.xlu0 %2942, %v1561_v21   ;;  %3140 = vrcp.f32 %v1514_v24  ;;  %v3188_v21 = vld [vmem:[%s3759_s13 + $0x20] sm:$0xff] }
 0x2bf   : > { %v3189_v23 = vld [vmem:[%s3767_s8 + $0x20] sm:$0xff] }
 0x2c2   : > { %v3133_v27 = vpop.eup %3132  ;;  %1704 = vperm.xlu1 %2943, %v1558_v26  }
 0x2c3   : > { %1633 = vperm.xlu0 %2942, %v3133_v27   ;;  %v1563_v28 = vsub.f32 1.0, %v3133_v27  ;;  %v3135_v0 = vpop.eup %3134 }
 0x2c4   : > { %v3137_v29 = vpop.eup %3136  ;;  %v1516_v30 = vadd.f32 1.0, %v3135_v0 }
 0x2c5   : > { %v1560_v31 = vsub.f32 1.0, %v3137_v29 }
 0x2c6   : > { %1618 = vperm.xlu1 %2943, %v3137_v29   ;;  %3142 = vrcp.f32 %v1516_v30  ;;  %v3190_v29 = vld [vmem:[%s3759_s13 + $0x48] sm:$0xff] }
 0x2c7   : > { %1729 = vperm.xlu0 %2942, %v1563_v28   ;;  %v3139_v6 = vpop.eup %3138 }
 0x2c8   : > { %v1565_v32 = vsub.f32 1.0, %v3139_v6  ;;  %v3141_v33 = vpop.eup %3140 }
 0x2c9   : > { %v1562_v34 = vsub.f32 1.0, %v3141_v33 }
 0x2ca   : > { %1714 = vperm.xlu1 %2943, %v1560_v31  }
 0x2cb   : > { %1643 = vperm.xlu0 %2942, %v3139_v6   ;;  %v3191_v6 = vld [vmem:[%s3767_s8 + $0x48] sm:$0xff] }
 0x2ce   : > { %1628 = vperm.xlu1 %2943, %v3141_v33  }
 0x2cf   : > { %1739 = vperm.xlu0 %2942, %v1565_v32  }
 0x2d0   : > { %v3143_v19 = vpop.eup %3142 }
 0x2d1   : > { %v1564_v35 = vsub.f32 1.0, %v3143_v19 }
 0x2d2   : > { %1724 = vperm.xlu1 %2943, %v1562_v34   ;;  %v3192_v34 = vld [vmem:[%s3759_s13 + $0x30] sm:$0xff] }
 0x2d6   : > { %1638 = vperm.xlu1 %2943, %v3143_v19  }
 0x2da   : > { %1734 = vperm.xlu1 %2943, %v1564_v35  }
 0x30d   : > { %v1569_v37 = vpop.permute.xlu0 %1568 }
 0x30e   : > { %v1646_v40 = vmul.f32 %v3176_v39, %v1569_v37 }
 0x311   : > { %v1574_v36 = vpop.permute.xlu1 %1573 }
 0x312   : > { %v1647_v46 = vmul.f32 %v3178_v45, %v1574_v36  ;;  %v3193_v36 = vld [vmem:[%s3767_s8 + $0x30] sm:$0xff] }
 0x315   : > { %v1665_v38 = vpop.permute.xlu1 %1664 }
 0x316   : > { %v1742_v42 = vmul.f32 %v3177_v41, %v1665_v38  ;;  %v3194_v41 = vld [vmem:[%s3759_s13 + $0x58] sm:$0xff] }
 0x318   : > { %v3994_v43 = vadd.f32 %v1742_v42, %v1646_v40 }
 0x319   : > { %v1670_v44 = vpop.permute.xlu1 %1669 }
 0x31a   : > { %v1743_v48 = vmul.f32 %v3179_v47, %v1670_v44  ;;  %1774 = vadd.xlane.f32.xlu1 %v3994_v43  ;;  %v3195_v44 = vld [vmem:[%s3767_s8 + $0x58] sm:$0xff] }
 0x31c   : > { %v3999_v49 = vadd.f32 %v1743_v48, %v1647_v46  ;;  %v3196_v48 = vld [vmem:[%s3759_s13 + $0x40] sm:$0xff] }
 0x31d   : > { %v1579_v50 = vpop.permute.xlu1 %1578 }
 0x31e   : > { %1776 = vadd.xlane.f32.xlu0 %v3999_v49  ;;  %v1648_v61 = vmul.f32 %v3180_v58, %v1579_v50 }
 0x321   : > { %v1584_v52 = vpop.permute.xlu1 %1583  ;;  %v1594_v53 = vpop.permute.xlu0 %1593 }
 0x322   : > { %v1649_v7 = vmul.f32 %v3182_v5, %v1584_v52  ;;  %v1651_v16 = vmul.f32 %v3185_v15, %v1594_v53  ;;  %v3197_v53 = vld [vmem:[%s3767_s8 + $0x40] sm:$0xff] }
 0x325   : > { %v1675_v55 = vpop.permute.xlu1 %1674  ;;  %v1690_v62 = vpop.permute.xlu0 %1689 }
 0x326   : > { %v1744_v1 = vmul.f32 %v3181_v63, %v1675_v55  ;;  %v1747_v12 = vmul.f32 %v3184_v11, %v1690_v62  ;;  %v3198_v63 = vld [vmem:[%s3759_s13 + $0x68] sm:$0xff] }
 0x328   : > { %v4004_v2 = vadd.f32 %v1744_v1, %v1648_v61  ;;  %v4015_v57 = vadd.f32 %v1747_v12, %v1651_v16  ;;  %v3201_v12 = vld [vmem:[%s3767_s8 + $0x50] sm:$0xff] }
 0x329   : > { %v1680_v3 = vpop.permute.xlu1 %1679  ;;  %v1604_v8 = vpop.permute.xlu0 %1603 }
 0x32a   : > { %v1745_v10 = vmul.f32 %v3183_v9, %v1680_v3  ;;  %1778 = vadd.xlane.f32.xlu0 %v4004_v2  ;;  %v1653_v59 = vmul.f32 %v3187_v20, %v1604_v8  ;;  %v3199_v3 = vld [vmem:[%s3767_s8 + $0x68] sm:$0xff]  ;;  %v3200_v9 = vld [vmem:[%s3759_s13 + $0x50] sm:$0xff] }
 0x32c   : > { %v4010_v13 = vadd.f32 %v1745_v10, %v1649_v7 }
 0x32d   : > { %v1589_v14 = vpop.permute.xlu1 %1588  ;;  %v1700_v56 = vpop.permute.xlu0 %1699 }
 0x32e   : > { %1780 = vadd.xlane.f32.xlu1 %v4010_v13  ;;  %v1749_v18 = vmul.f32 %v3186_v17, %v1700_v56  ;;  %v1650_v22 = vmul.f32 %v3188_v21, %v1589_v14  ;;  %v3202_v17 = vld [vmem:[%s3759_s13 + $0x78] sm:$0xff] }
 0x330   : > { %v4023_v27 = vadd.f32 %v1749_v18, %v1653_v59 }
 0x331   : > { %v1685_v4 = vpop.permute.xlu1 %1684  ;;  %v1614_v60 = vpop.permute.xlu0 %1613 }
 0x332   : > { %v1746_v24 = vmul.f32 %v3189_v23, %v1685_v4  ;;  %1784 = vadd.xlane.f32.xlu1 %v4015_v57  ;;  %v1655_v30 = vmul.f32 %v3190_v29, %v1614_v60  ;;  %v3203_v4 = vld [vmem:[%s3767_s8 + $0x78] sm:$0xff]  ;;  %v3205_v23 = vld [vmem:[%s3767_s8 + $0x60] sm:$0xff] }
 0x334   : > { %v4021_v26 = vadd.f32 %v1746_v24, %v1650_v22  ;;  %v3204_v22 = vld [vmem:[%s3759_s13 + $0x60] sm:$0xff] }
 0x335   : > { %v1599_v28 = vpop.permute.xlu1 %1598  ;;  %v1710_v0 = vpop.permute.xlu0 %1709 }
 0x336   : > { %1782 = vadd.xlane.f32.xlu0 %v4021_v26  ;;  %1788 = vadd.xlane.f32.xlu1 %v4023_v27  ;;  %v1751_v31 = vmul.f32 %v3191_v6, %v1710_v0  ;;  %v1652_v19 = vmul.f32 %v3192_v34, %v1599_v28 }
 0x338   : > { %v4029_v33 = vadd.f32 %v1751_v31, %v1655_v30  ;;  %v3206_v30 = vld [vmem:[%s3759_s13 + $0x70] sm:$0xff]  ;;  %s2536_s13 = sshll.u32 %s4265_s29, 4  ;;  %s4302_s13 = int_to_ptr.vmem [resolvable:$true] %s2536_s13 }
 0x339   : > { %v1695_v32 = vpop.permute.xlu1 %1694  ;;  %v1624_v35 = vpop.permute.xlu0 %1623  ;;  %v3207_v31 = vld [vmem:[%s3767_s8 + $0x70] sm:$0xff]  ;;  %s4404_s8 = sld [smem:[#allocation27_spill]]  ;;  %s3352_s12 = scalar_lea.vmem %s4302_s13, 2048 }
 0x33a   : > { %v1748_v37 = vmul.f32 %v3193_v36, %v1695_v32  ;;  %1792 = vadd.xlane.f32.xlu1 %v4029_v33  ;;  %v1657_v42 = vmul.f32 %v3194_v41, %v1624_v35  ;;  %v3042_v35 = vld [vmem:[#allocation9 + $0x4] ss:$8 sps:$4 sm:$0xff]   ;;  %v3045_v36 = vld [vmem:[#allocation9 + $0x14] ss:$8 sps:$4 sm:$0xff]   ;;  %p3353_p1 = scmp.ne.s32.totalorder %s4302_s13, %s3352_s12  ;;  %p3359_p8 = scmp.lt.s32.totalorder %s4302_s13, %s3357_s22 }
 0x33b   : > { %2113 = vmatprep.subr.bf16.mxu0 %v3042_v35  ;;  %v3051_v41 = vld [vmem:[#allocation9 + $0x34] ss:$8 sps:$4 sm:$0xff]   ;;  %p3360_p6 = scmp.lt.s32.totalorder %s3358_s2, %s3352_s12 }
 0x33c   : > { %v4034_v38 = vadd.f32 %v1748_v37, %v1652_v19  ;;  %v3040_v19 = vld [vmem:[#allocation9] ss:$8 sps:$4 sm:$0xff]   ;;  %v3043_v37 = vld [vmem:[#allocation9 + $0x10] ss:$8 sps:$4 sm:$0xff]   ;;  %p3354_p4 = pnand %p3353_p1, %p3660_p5 }
 0x33d   : > { %v1609_v39 = vpop.permute.xlu1 %1608  ;;  %v1720_v40 = vpop.permute.xlu0 %1719  ;;  %2114 = vmatpush1.bf16.msra.mxu0 %v3040_v19  ;;  %p3361_p10 = por %p3360_p6, %p3359_p8 }
 0x33e   : > { %1786 = vadd.xlane.f32.xlu0 %v4034_v38  ;;  %v1753_v45 = vmul.f32 %v3195_v44, %v1720_v40  ;;  %v1654_v50 = vmul.f32 %v3196_v48, %v1609_v39  ;;  %2115 = vmatprep.subr.bf16.mxu0 %v3045_v36  ;;  %v3048_v39 = vld [vmem:[#allocation9 + $0x24] ss:$8 sps:$4 sm:$0xff]   ;;  %v3046_v40 = vld [vmem:[#allocation9 + $0x20] ss:$8 sps:$4 sm:$0xff]   ;;  %v3063_v36 = vld [vmem:[#allocation9 + $0x74] ss:$8 sps:$4 sm:$0xff]   ;;  %p3355_p0 = pneg %p3354_p4 }
 0x33f   : > { %s4300_s28 = scalar_lea.hbm %s4404_s8, %s2786_s17 }
 0x340   : > { %v4039_v46 = vadd.f32 %v1753_v45, %v1657_v42  ;;  %v3049_v42 = vld [vmem:[#allocation9 + $0x30] ss:$8 sps:$4 sm:$0xff]   ;;  %p3362_p3 = pnand %p3361_p10, %p3355_p0 }
 0x341   : > { %v1705_v47 = vpop.permute.xlu1 %1704  ;;  %2116 = vmatpush1.bf16.msra.mxu0 %v3043_v37 }
 0x342   : > { %v1634_v52 = vpop.permute.xlu0 %1633  ;;  %v1750_v55 = vmul.f32 %v3197_v53, %v1705_v47  ;;  %1796 = vadd.xlane.f32.xlu1 %v4039_v46  ;;  %2117 = vmatprep.subr.bf16.mxu0 %v3048_v39 }
 0x343   : > { %v1659_v1 = vmul.f32 %v3198_v63, %v1634_v52 }
 0x344   : > { %v4044_v58 = vadd.f32 %v1750_v55, %v1654_v50 }
 0x345   : > { %v1619_v61 = vpop.permute.xlu1 %1618  ;;  %2118 = vmatpush1.bf16.msra.mxu0 %v3046_v40 }
 0x346   : > { %v1730_v62 = vpop.permute.xlu0 %1729  ;;  %1790 = vadd.xlane.f32.xlu0 %v4044_v58  ;;  %v1656_v10 = vmul.f32 %v3200_v9, %v1619_v61  ;;  %2119 = vmatprep.subr.bf16.mxu0 %v3051_v41 }
 0x347   : > { %v1755_v5 = vmul.f32 %v3199_v3, %v1730_v62 }
 0x349   : > { %v4049_v7 = vadd.f32 %v1755_v5, %v1659_v1  ;;  %v1715_v8 = vpop.permute.xlu1 %1714  ;;  %2120 = vmatpush1.bf16.msra.mxu0 %v3049_v42 }
 0x34a   : > { %v1644_v11 = vpop.permute.xlu0 %1643  ;;  %v1752_v14 = vmul.f32 %v3201_v12, %v1715_v8 }
 0x34b   : > { %1800 = vadd.xlane.f32.xlu1 %v4049_v7  ;;  %v1661_v18 = vmul.f32 %v3202_v17, %v1644_v11 }
 0x34c   : > { %v4054_v15 = vadd.f32 %v1752_v14, %v1656_v10 }
 0x34d   : > { %v1629_v16 = vpop.permute.xlu1 %1628 }
 0x34e   : > { %v1740_v56 = vpop.permute.xlu0 %1739  ;;  %1794 = vadd.xlane.f32.xlu0 %v4054_v15  ;;  %v1658_v60 = vmul.f32 %v3204_v22, %v1629_v16 }
 0x34f   : > { %v1757_v20 = vmul.f32 %v3203_v4, %v1740_v56 }
 0x351   : > { %v4059_v59 = vadd.f32 %v1757_v20, %v1661_v18  ;;  %v1725_v21 = vpop.permute.xlu1 %1724  ;;  %v3054_v20 = vld [vmem:[#allocation9 + $0x44] ss:$8 sps:$4 sm:$0xff]  }
 0x352   : > { %v1754_v24 = vmul.f32 %v3205_v23, %v1725_v21  ;;  %v3052_v21 = vld [vmem:[#allocation9 + $0x40] ss:$8 sps:$4 sm:$0xff]   ;;  %2121 = vmatprep.subr.bf16.mxu0 %v3054_v20  ;;  %v3057_v23 = vld [vmem:[#allocation9 + $0x54] ss:$8 sps:$4 sm:$0xff]  }
 0x353   : > { %1804 = vadd.xlane.f32.xlu1 %v4059_v59  ;;  %2122 = vmatpush1.bf16.msra.mxu0 %v3052_v21 }
 0x354   : > { %v4064_v28 = vadd.f32 %v1754_v24, %v1658_v60  ;;  %2123 = vmatprep.subr.bf16.mxu0 %v3057_v23 }
 0x355   : > { %v1639_v0 = vpop.permute.xlu1 %1638 }
 0x356   : > { %1798 = vadd.xlane.f32.xlu0 %v4064_v28  ;;  %v1660_v6 = vmul.f32 %v3206_v30, %v1639_v0  ;;  %v3055_v0 = vld [vmem:[#allocation9 + $0x50] ss:$8 sps:$4 sm:$0xff]  }
 0x357   : > { %2124 = vmatpush1.bf16.msra.mxu0 %v3055_v0 }
 0x359   : > { %v1735_v29 = vpop.permute.xlu1 %1734 }
 0x35a   : > { %v1756_v32 = vmul.f32 %v3207_v31, %v1735_v29  ;;  %v3060_v31 = vld [vmem:[#allocation9 + $0x64] ss:$8 sps:$4 sm:$0xff]  }
 0x35b   : > { %2125 = vmatprep.subr.bf16.mxu0 %v3060_v31 }
 0x35c   : > { %v4069_v34 = vadd.f32 %v1756_v32, %v1660_v6  ;;  %v3058_v6 = vld [vmem:[#allocation9 + $0x60] ss:$8 sps:$4 sm:$0xff]  }
 0x35d   : > { %2126 = vmatpush1.bf16.msra.mxu0 %v3058_v6 }
 0x35e   : > { %1802 = vadd.xlane.f32.xlu0 %v4069_v34  ;;  %2127 = vmatprep.subr.bf16.mxu0 %v3063_v36 }
 0x3a7   : > { %v1775_v44 = vpop.xlane.xlu1 %1774 }
 0x3a8   : > { %v1807_v45 = vmul.f32 0.0078125, %v1775_v44 }
 0x3aa   : > { %v4073_v47 = vsub.f32 %v3994_v43, %v1807_v45 }
 0x3ab   : > { %v1777_v48 = vpop.xlane.xlu0 %1776 }
 0x3ac   : > { %v1808_v50 = vmul.f32 0.0078125, %v1777_v48  ;;  %v1839_v52 = vmul.f32 %v4073_v47, %v4073_v47 }
 0x3ae   : > { %v4078_v53 = vsub.f32 %v3999_v49, %v1808_v50  ;;  %1855 = vadd.xlane.f32.xlu0 %v1839_v52 }
 0x3b0   : > { %v1840_v55 = vmul.f32 %v4078_v53, %v4078_v53 }
 0x3b2   : > { %1857 = vadd.xlane.f32.xlu1 %v1840_v55 }
 0x3b7   : > { %v1779_v61 = vpop.xlane.xlu0 %1778 }
 0x3b8   : > { %v1809_v62 = vmul.f32 0.0078125, %v1779_v61 }
 0x3ba   : > { %v4083_v63 = vsub.f32 %v4004_v2, %v1809_v62 }
 0x3bb   : > { %v1781_v43 = vpop.xlane.xlu1 %1780 }
 0x3bc   : > { %v1810_v1 = vmul.f32 0.0078125, %v1781_v43  ;;  %v1841_v3 = vmul.f32 %v4083_v63, %v4083_v63 }
 0x3be   : > { %v4088_v5 = vsub.f32 %v4010_v13, %v1810_v1  ;;  %1859 = vadd.xlane.f32.xlu0 %v1841_v3 }
 0x3bf   : > { %v1785_v49 = vpop.xlane.xlu1 %1784 }
 0x3c0   : > { %v1812_v8 = vmul.f32 0.0078125, %v1785_v49  ;;  %v1842_v9 = vmul.f32 %v4088_v5, %v4088_v5 }
 0x3c2   : > { %v4093_v10 = vsub.f32 %v4015_v57, %v1812_v8  ;;  %1861 = vadd.xlane.f32.xlu1 %v1842_v9  ;;  %v3064_v9 = vld [vmem:[#allocation11 + $0x40] sm:$0xff]  }
 0x3c3   : > { %v1789_v2 = vpop.xlane.xlu1 %1788  ;;  %v1783_v11 = vpop.xlane.xlu0 %1782  ;;  %2787 = vmatprep.subr.bf16.mxu1 %v3064_v9 }
 0x3c4   : > { %v1814_v12 = vmul.f32 0.0078125, %v1789_v2  ;;  %v1811_v14 = vmul.f32 0.0078125, %v1783_v11  ;;  %v1844_v16 = vmul.f32 %v4093_v10, %v4093_v10  ;;  %v3065_v2 = vld [vmem:[#allocation11] sm:$0xff]   ;;  %v3066_v11 = vld [vmem:[#allocation11 + $0x48] sm:$0xff]  }
 0x3c5   : > { %2788 = vmatpush3.bf16.msra.mxu1 %v3065_v2 }
 0x3c6   : > { %v4098_v13 = vsub.f32 %v4023_v27, %v1814_v12  ;;  %v4101_v56 = vsub.f32 %v4021_v26, %v1811_v14  ;;  %1865 = vadd.xlane.f32.xlu1 %v1844_v16  ;;  %2789 = vmatprep.subr.bf16.mxu1 %v3066_v11  ;;  %v3068_v12 = vld [vmem:[#allocation11 + $0x50] sm:$0xff]   ;;  %v3070_v16 = vld [vmem:[#allocation11 + $0x58] sm:$0xff]  }
 0x3c7   : > { %v1793_v17 = vpop.xlane.xlu1 %1792  ;;  %v3069_v14 = vld [vmem:[#allocation11 + $0x10] sm:$0xff]  }
 0x3c8   : > { %v1846_v57 = vmul.f32 %v4098_v13, %v4098_v13  ;;  %v1843_v18 = vmul.f32 %v4101_v56, %v4101_v56  ;;  %v1816_v4 = vmul.f32 0.0078125, %v1793_v17  ;;  %v3071_v17 = vld [vmem:[#allocation11 + $0x18] sm:$0xff]  }
 0x3ca   : > { %1869 = vadd.xlane.f32.xlu1 %v1846_v57  ;;  %1863 = vadd.xlane.f32.xlu0 %v1843_v18  ;;  %v4108_v22 = vsub.f32 %v4029_v33, %v1816_v4  ;;  %v3073_v57 = vld [vmem:[#allocation11 + $0x20] sm:$0xff]   ;;  %v3074_v18 = vld [vmem:[#allocation11 + $0x68] sm:$0xff]  }
 0x3cb   : > { %v1787_v27 = vpop.xlane.xlu0 %1786  ;;  %v3075_v4 = vld [vmem:[#allocation11 + $0x28] sm:$0xff]  }
 0x3cc   : > { %v1813_v26 = vmul.f32 0.0078125, %v1787_v27  ;;  %v1848_v60 = vmul.f32 %v4108_v22, %v4108_v22 }
 0x3ce   : > { %v4113_v24 = vsub.f32 %v4034_v38, %v1813_v26  ;;  %1873 = vadd.xlane.f32.xlu1 %v1848_v60  ;;  %v3061_v38 = vld [vmem:[#allocation9 + $0x70] ss:$8 sps:$4 sm:$0xff]  }
 0x3cf   : > { %v1797_v29 = vpop.xlane.xlu1 %1796  ;;  %2128 = vmatpush1.bf16.msra.mxu0 %v3061_v38 }
 0x3d0   : > { %v1845_v30 = vmul.f32 %v4113_v24, %v4113_v24  ;;  %v1818_v33 = vmul.f32 0.0078125, %v1797_v29 }
 0x3d2   : > { %1867 = vadd.xlane.f32.xlu0 %v1845_v30  ;;  %v4118_v32 = vsub.f32 %v4039_v46, %v1818_v33  ;;  %v4156_v33 = vld [vmem:[%s4355_s6] ss:$0 sm:$0xff] }
 0x3d3   : > { %v1791_v19 = vpop.xlane.xlu0 %1790 }
 0x3d4   : > { %v1815_v35 = vmul.f32 0.0078125, %v1791_v19  ;;  %v1850_v37 = vmul.f32 %v4118_v32, %v4118_v32 }
 0x3d6   : > { %v4123_v39 = vsub.f32 %v4044_v58, %v1815_v35  ;;  %1877 = vadd.xlane.f32.xlu1 %v1850_v37 }
 0x3d8   : > { %v1801_v40 = vpop.xlane.xlu1 %1800  ;;  %v1847_v41 = vmul.f32 %v4123_v39, %v4123_v39 }
 0x3d9   : > { %v1820_v46 = vmul.f32 0.0078125, %v1801_v40 }
 0x3da   : > { %1871 = vadd.xlane.f32.xlu0 %v1847_v41 }
 0x3db   : > { %v4128_v42 = vsub.f32 %v4049_v7, %v1820_v46  ;;  %v1795_v44 = vpop.xlane.xlu0 %1794 }
 0x3dc   : > { %v1817_v45 = vmul.f32 0.0078125, %v1795_v44 }
 0x3dd   : > { %v1852_v48 = vmul.f32 %v4128_v42, %v4128_v42 }
 0x3de   : > { %v4133_v58 = vsub.f32 %v4054_v15, %v1817_v45 }
 0x3df   : > { %1881 = vadd.xlane.f32.xlu1 %v1852_v48 }
 0x3e0   : > { %v1805_v50 = vpop.xlane.xlu1 %1804  ;;  %v1849_v52 = vmul.f32 %v4133_v58, %v4133_v58 }
 0x3e1   : > { %v1822_v55 = vmul.f32 0.0078125, %v1805_v50 }
 0x3e2   : > { %1875 = vadd.xlane.f32.xlu0 %v1849_v52 }
 0x3e3   : > { %v4138_v61 = vsub.f32 %v4059_v59, %v1822_v55  ;;  %v1799_v7 = vpop.xlane.xlu0 %1798 }
 0x3e4   : > { %v1819_v62 = vmul.f32 0.0078125, %v1799_v7 }
 0x3e5   : > { %v1854_v43 = vmul.f32 %v4138_v61, %v4138_v61 }
 0x3e6   : > { %v4143_v1 = vsub.f32 %v4064_v28, %v1819_v62  ;;  %v3067_v28 = vld [vmem:[#allocation11 + $0x8] sm:$0xff]  }
 0x3e7   : > { %1885 = vadd.xlane.f32.xlu1 %v1854_v43  ;;  %2790 = vmatpush3.bf16.msra.mxu1 %v3067_v28 }
 0x3e8   : > { %v1851_v15 = vmul.f32 %v4143_v1, %v4143_v1  ;;  %2791 = vmatprep.subr.bf16.mxu1 %v3068_v12 }
 0x3ea   : > { %1879 = vadd.xlane.f32.xlu0 %v1851_v15 }
 0x3eb   : > { %v1803_v3 = vpop.xlane.xlu0 %1802  ;;  %2792 = vmatpush3.bf16.msra.mxu1 %v3069_v14 }
 0x3ec   : > { %v1821_v49 = vmul.f32 0.0078125, %v1803_v3  ;;  %2793 = vmatprep.subr.bf16.mxu1 %v3070_v16 }
 0x3ee   : > { %v4148_v8 = vsub.f32 %v4069_v34, %v1821_v49  ;;  %v3072_v34 = vld [vmem:[#allocation11 + $0x60] sm:$0xff]  }
 0x3ef   : > { %2794 = vmatpush3.bf16.msra.mxu1 %v3071_v17 }
 0x3f0   : > { %v1853_v59 = vmul.f32 %v4148_v8, %v4148_v8  ;;  %2795 = vmatprep.subr.bf16.mxu1 %v3072_v34 }
 0x3f2   : > { %1883 = vadd.xlane.f32.xlu0 %v1853_v59 }
 0x3f3   : > { %2796 = vmatpush3.bf16.msra.mxu1 %v3073_v57 }
 0x3f4   : > { %2797 = vmatprep.subr.bf16.mxu1 %v3074_v18 }
 0x3f7   : > { %2798 = vmatpush3.bf16.msra.mxu1 %v3075_v4 }
 0x43b   : > { %v1856_v20 = vpop.xlane.xlu0 %1855 }
 0x43c   : > { %v1887_v21 = vmul.f32 0.0078125, %v1856_v20 }
 0x43e   : > { %v1903_v27 = vadd.f32 1e-05, %v1887_v21 }
 0x43f   : > { %v1858_v26 = vpop.xlane.xlu1 %1857 }
 0x440   : > { %3144 = vrsqrt.f32 %v1903_v27  ;;  %v1888_v60 = vmul.f32 0.0078125, %v1858_v26 }
 0x442   : > { %v1904_v23 = vadd.f32 1e-05, %v1888_v60 }
 0x444   : > { %3146 = vrsqrt.f32 %v1904_v23 }
 0x44a   : > { %v3145_v0 = vpop.eup %3144 }
 0x44b   : > { %v1935_v29 = vmul.f32 %v3145_v0, %v4073_v47  ;;  %v1860_v30 = vpop.xlane.xlu0 %1859  ;;  %v4163_v47 = vld [vmem:[%s4356_s7] ss:$0 sm:$0xff] }
 0x44c   : > { %v1889_v6 = vmul.f32 0.0078125, %v1860_v30 }
 0x44d   : > { %v1958_v35 = vmul.f32 %v4156_v33, %v1935_v29 }
 0x44e   : > { %v3147_v31 = vpop.eup %3146  ;;  %v1905_v19 = vadd.f32 1e-05, %v1889_v6 }
 0x44f   : > { %v1936_v38 = vmul.f32 %v3147_v31, %v4078_v53  ;;  %v1862_v36 = vpop.xlane.xlu1 %1861  ;;  %v1981_v44 = vadd.f32 %v4163_v47, %v1958_v35 }
 0x450   : > { %3148 = vrsqrt.f32 %v1905_v19  ;;  %v1890_v37 = vmul.f32 0.0078125, %v1862_v36 }
 0x451   : > { %v1959_v40 = vmul.f32 %v4156_v33, %v1936_v38 }
 0x452   : > { %v1906_v41 = vadd.f32 1e-05, %v1890_v37 }
 0x453   : > { %v1866_v46 = vpop.xlane.xlu1 %1865  ;;  %v1982_v45 = vadd.f32 %v4163_v47, %v1959_v40 }
 0x454   : > { %3150 = vrsqrt.f32 %v1906_v41  ;;  %v1892_v48 = vmul.f32 0.0078125, %v1866_v46 }
 0x455   : > { %v1997_v50 = vpack.c.bf16 %v1982_v45, %v1981_v44 }
 0x456   : > { %v1908_v53 = vadd.f32 1e-05, %v1892_v48 }
 0x457   : > { %v1870_v52 = vpop.xlane.xlu1 %1869  ;;  %2146 = vmatmul.mubr.bf16.vlgmr.msra.gmra.mrb[32].mxu0 %v1997_v50  ;;  %v1864_v55 = vpop.xlane.xlu0 %1863 }
 0x458   : > { %3152 = vrsqrt.f32 %v1908_v53  ;;  %v1894_v7 = vmul.f32 0.0078125, %v1870_v52  ;;  %v1891_v62 = vmul.f32 0.0078125, %v1864_v55  ;;  %2155 = vmatprep.mubr.bf16.mxu0 %v3443_v25 }
 0x45a   : > { %v3149_v43 = vpop.eup %3148  ;;  %v1910_v15 = vadd.f32 1e-05, %v1894_v7  ;;  %v1907_v3 = vadd.f32 1e-05, %v1891_v62 }
 0x45b   : > { %v1937_v49 = vmul.f32 %v3149_v43, %v4083_v63  ;;  %v1874_v59 = vpop.xlane.xlu1 %1873 }
 0x45c   : > { %3154 = vrsqrt.f32 %v1907_v3  ;;  %v1896_v2 = vmul.f32 0.0078125, %v1874_v59 }
 0x45d   : > { %3156 = vrsqrt.f32 %v1910_v15  ;;  %v1960_v12 = vmul.f32 %v4156_v33, %v1937_v49 }
 0x45e   : > { %v3151_v9 = vpop.eup %3150  ;;  %v1912_v34 = vadd.f32 1e-05, %v1896_v2 }
 0x45f   : > { %v1868_v11 = vpop.xlane.xlu0 %1867  ;;  %v1938_v28 = vmul.f32 %v3151_v9, %v4088_v5  ;;  %v1983_v18 = vadd.f32 %v4163_v47, %v1960_v12 }
 0x460   : > { %v1893_v14 = vmul.f32 0.0078125, %v1868_v11 }
 0x461   : > { %v1961_v16 = vmul.f32 %v4156_v33, %v1938_v28 }
 0x462   : > { %v3153_v17 = vpop.eup %3152  ;;  %v1909_v57 = vadd.f32 1e-05, %v1893_v14 }
 0x463   : > { %v1984_v63 = vadd.f32 %v4163_v47, %v1961_v16  ;;  %v1878_v4 = vpop.xlane.xlu1 %1877  ;;  %v1940_v20 = vmul.f32 %v3153_v17, %v4093_v10 }
 0x464   : > { %3158 = vrsqrt.f32 %v1909_v57  ;;  %v1898_v27 = vmul.f32 0.0078125, %v1878_v4 }
 0x465   : > { %v1998_v21 = vpack.c.bf16 %v1984_v63, %v1983_v18  ;;  %3160 = vrsqrt.f32 %v1912_v34  ;;  %v1963_v29 = vmul.f32 %v4156_v33, %v1940_v20 }
 0x466   : > { %v3155_v5 = vpop.eup %3154  ;;  %v1914_v30 = vadd.f32 1e-05, %v1898_v27 }
 0x467   : > { %2156 = vmatmul.mubr.bf16.gmra.mrb[36].mxu0 %v1998_v21  ;;  %v1872_v26 = vpop.xlane.xlu0 %1871  ;;  %v3157_v60 = vpop.eup %3156  ;;  %v1939_v0 = vmul.f32 %v3155_v5, %v4101_v56  ;;  %v1986_v38 = vadd.f32 %v4163_v47, %v1963_v29 }
 0x468   : > { %v1895_v23 = vmul.f32 0.0078125, %v1872_v26  ;;  %2165 = vmatprep.mubr.bf16.mxu0 %v3443_v25  ;;  %v1942_v10 = vmul.f32 %v3157_v60, %v4098_v13 }
 0x469   : > { %v1962_v31 = vmul.f32 %v4156_v33, %v1939_v0 }
 0x46a   : > { %v1911_v6 = vadd.f32 1e-05, %v1895_v23  ;;  %v1965_v46 = vmul.f32 %v4156_v33, %v1942_v10 }
 0x46b   : > { %v1985_v35 = vadd.f32 %v4163_v47, %v1962_v31 }
 0x46c   : > { %3162 = vrsqrt.f32 %v1911_v6  ;;  %v1882_v19 = vpop.xlane.xlu1 %1881  ;;  %v1988_v52 = vadd.f32 %v4163_v47, %v1965_v46 }
 0x46d   : > { %3164 = vrsqrt.f32 %v1914_v30  ;;  %v1900_v37 = vmul.f32 0.0078125, %v1882_v19  ;;  %v1999_v40 = vpack.c.bf16 %v1986_v38, %v1985_v35 }
 0x46e   : > { %v3159_v36 = vpop.eup %3158 }
 0x46f   : > { %v1876_v41 = vpop.xlane.xlu0 %1875  ;;  %v1941_v56 = vmul.f32 %v3159_v36, %v4113_v24  ;;  %v3161_v44 = vpop.eup %3160  ;;  %2166 = vmatmul.mubr.bf16.gmra.mrb[40].mxu0 %v1999_v40  ;;  %v1916_v48 = vadd.f32 1e-05, %v1900_v37  ;;  %v3076_v37 = vld [vmem:[#allocation11 + $0x70] sm:$0xff]  }
 0x470   : > { %v1897_v45 = vmul.f32 0.0078125, %v1876_v41  ;;  %2175 = vmatprep.mubr.bf16.mxu0 %v3443_v25  ;;  %v1944_v55 = vmul.f32 %v3161_v44, %v4108_v22  ;;  %v3077_v40 = vld [vmem:[#allocation11 + $0x30] sm:$0xff]   ;;  %2799 = vmatprep.subr.bf16.mxu1 %v3076_v37  ;;  %v3079_v41 = vld [vmem:[#allocation11 + $0x38] sm:$0xff]  }
 0x471   : > { %v1964_v13 = vmul.f32 %v4156_v33, %v1941_v56  ;;  %2800 = vmatpush3.bf16.msra.mxu1 %v3077_v40 }
 0x472   : > { %v1913_v50 = vadd.f32 1e-05, %v1897_v45  ;;  %v1967_v49 = vmul.f32 %v4156_v33, %v1944_v55 }
 0x473   : > { %v1987_v53 = vadd.f32 %v4163_v47, %v1964_v13 }
 0x474   : > { %3166 = vrsqrt.f32 %v1913_v50  ;;  %v1886_v7 = vpop.xlane.xlu1 %1885  ;;  %v1990_v12 = vadd.f32 %v4163_v47, %v1967_v49 }
 0x475   : > { %v2000_v24 = vpack.c.bf16 %v1988_v52, %v1987_v53  ;;  %3168 = vrsqrt.f32 %v1916_v48  ;;  %v1902_v43 = vmul.f32 0.0078125, %v1886_v7 }
 0x476   : > { %v3163_v62 = vpop.eup %3162 }
 0x477   : > { %v1880_v15 = vpop.xlane.xlu0 %1879  ;;  %v1943_v3 = vmul.f32 %v3163_v62, %v4123_v39  ;;  %v3165_v59 = vpop.eup %3164  ;;  %2176 = vmatmul.mubr.bf16.gmra.mrb[44].mxu0 %v2000_v24  ;;  %v1918_v11 = vadd.f32 1e-05, %v1902_v43 }
 0x478   : > { %v1899_v9 = vmul.f32 0.0078125, %v1880_v15  ;;  %2185 = vmatprep.mubr.bf16.mxu0 %v3443_v25  ;;  %v1946_v14 = vmul.f32 %v3165_v59, %v4118_v32 }
 0x479   : > { %v1966_v2 = vmul.f32 %v4156_v33, %v1943_v3 }
 0x47a   : > { %v1915_v22 = vadd.f32 1e-05, %v1899_v9  ;;  %v1969_v57 = vmul.f32 %v4156_v33, %v1946_v14 }
 0x47b   : > { %v1989_v28 = vadd.f32 %v4163_v47, %v1966_v2 }
 0x47c   : > { %3170 = vrsqrt.f32 %v1915_v22  ;;  %v1992_v32 = vadd.f32 %v4163_v47, %v1969_v57 }
 0x47d   : > { %v2001_v16 = vpack.c.bf16 %v1990_v12, %v1989_v28  ;;  %3172 = vrsqrt.f32 %v1918_v11 }
 0x47e   : > { %v3167_v39 = vpop.eup %3166 }
 0x47f   : > { %v1884_v17 = vpop.xlane.xlu0 %1883  ;;  %v1945_v34 = vmul.f32 %v3167_v39, %v4133_v58  ;;  %v3169_v18 = vpop.eup %3168  ;;  %2186 = vmatmul.mubr.bf16.gmra.mrb[48].mxu0 %v2001_v16 }
 0x480   : > { %v1901_v63 = vmul.f32 0.0078125, %v1884_v17  ;;  %2195 = vmatprep.mubr.bf16.mxu0 %v3443_v25  ;;  %v1948_v27 = vmul.f32 %v3169_v18, %v4128_v42 }
 0x481   : > { %v1968_v4 = vmul.f32 %v4156_v33, %v1945_v34 }
 0x482   : > { %v1917_v20 = vadd.f32 1e-05, %v1901_v63  ;;  %v1971_v60 = vmul.f32 %v4156_v33, %v1948_v27 }
 0x483   : > { %v1991_v21 = vadd.f32 %v4163_v47, %v1968_v4 }
 0x484   : > { %3174 = vrsqrt.f32 %v1917_v20  ;;  %v1994_v30 = vadd.f32 %v4163_v47, %v1971_v60 }
 0x485   : > { %v2002_v5 = vpack.c.bf16 %v1992_v32, %v1991_v21 }
 0x486   : > { %v3171_v26 = vpop.eup %3170 }
 0x487   : > { %v1947_v58 = vmul.f32 %v3171_v26, %v4143_v1  ;;  %v3173_v23 = vpop.eup %3172  ;;  %2196 = vmatmul.mubr.bf16.gmra.mrb[52].mxu0 %v2002_v5 }
 0x488   : > { %2205 = vmatprep.mubr.bf16.mxu0 %v3443_v25  ;;  %v1950_v6 = vmul.f32 %v3173_v23, %v4138_v61  ;;  %v3078_v61 = vld [vmem:[#allocation11 + $0x78] sm:$0xff]  }
 0x489   : > { %v1970_v0 = vmul.f32 %v4156_v33, %v1947_v58  ;;  %2801 = vmatprep.subr.bf16.mxu1 %v3078_v61 }
 0x48a   : > { %v1973_v1 = vmul.f32 %v4156_v33, %v1950_v6  ;;  %2802 = vmatpush3.bf16.msra.mxu1 %v3079_v41 }
 0x48b   : > { %v1993_v29 = vadd.f32 %v4163_v47, %v1970_v0 }
 0x48c   : > { %v1996_v38 = vadd.f32 %v4163_v47, %v1973_v1 }
 0x48d   : > { %v2003_v42 = vpack.c.bf16 %v1994_v30, %v1993_v29 }
 0x48e   : > { %v3175_v31 = vpop.eup %3174 }
 0x48f   : > { %v1949_v10 = vmul.f32 %v3175_v31, %v4148_v8  ;;  %2206 = vmatmul.mubr.bf16.gmra.mrb[56].mxu0 %v2003_v42 }
 0x490   : > { %2215 = vmatprep.mubr.bf16.mxu0 %v3443_v25  ;;  %v2021_v25 = vld [vmem:[%s4358_s9] sm:$0x3] }
 0x491   : > { %v1972_v19 = vmul.f32 %v4156_v33, %v1949_v10  ;;  %v4221_v8 = vrot.slane %v2021_v25, %v3813_v51  ;;  %v4224_v33 = vrot.slane %v2021_v25, %v3818_v54 }
 0x493   : > { %v1995_v35 = vadd.f32 %v4163_v47, %v1972_v19 }
 0x495   : > { %v2004_v36 = vpack.c.bf16 %v1996_v38, %v1995_v35 }
 0x497   : > { %2216 = vmatmul.mubr.bf16.gmra.mrb[60].mxu0 %v2004_v36 }
 0x52a   : > { %v2147_v47 = vpop.f32.mrb[32].mxu0 }
 0x52b   : > { %v2148_v56 = vadd.f32 %v2147_v47, %v4221_v8  ;;  %v2149_v46 = vpop.f32.mrb[33].mxu0 }
 0x52c   : > { %v2150_v44 = vadd.f32 %v2149_v46, %v4224_v33  ;;  %v2151_v45 = vpop.f32.mrb[34].mxu0 }
 0x52d   : > { %v2152_v13 = vadd.f32 %v2151_v45, %v4221_v8  ;;  %v2153_v48 = vpop.f32.mrb[35].mxu0  ;;  %v2226_v53 = vmax.f32 %v2148_v56, 0.0 }
 0x52e   : > { %v2154_v50 = vadd.f32 %v2153_v48, %v4224_v33  ;;  %v2227_v55 = vmax.f32 %v2150_v44, 0.0 }
 0x52f   : > { %v2228_v52 = vmax.f32 %v2152_v13, 0.0 }
 0x530   : > { %v2229_v51 = vmax.f32 %v2154_v50, 0.0 }
 0x531   : > { %v2258_v7 = vpack.c.bf16 %v2228_v52, %v2226_v53 }
 0x532   : > { %v2259_v24 = vpack.c.bf16 %v2229_v51, %v2227_v55 }
 0x534   : > { %2441 = vmatprep.mubr.bf16.mxu1 %v2259_v24 }
 0x535   : > { %2442 = vmatmul.mubr.bf16.vlgmr.msra.gmra.mrb[32].mxu1 %v2258_v7 }
 0x53a   : > { %v2157_v54 = vpop.f32.mrb[36].mxu0 }
 0x53b   : > { %v2158_v62 = vadd.f32 %v2157_v54, %v4221_v8  ;;  %v2159_v43 = vpop.f32.mrb[37].mxu0 }
 0x53c   : > { %v2160_v15 = vadd.f32 %v2159_v43, %v4224_v33  ;;  %v2161_v3 = vpop.f32.mrb[38].mxu0 }
 0x53d   : > { %v2162_v49 = vadd.f32 %v2161_v3, %v4221_v8  ;;  %v2163_v59 = vpop.f32.mrb[39].mxu0  ;;  %v2230_v2 = vmax.f32 %v2158_v62, 0.0 }
 0x53e   : > { %v2164_v9 = vadd.f32 %v2163_v59, %v4224_v33  ;;  %v2231_v22 = vmax.f32 %v2160_v15, 0.0 }
 0x53f   : > { %v2232_v11 = vmax.f32 %v2162_v49, 0.0 }
 0x540   : > { %v2233_v28 = vmax.f32 %v2164_v9, 0.0 }
 0x541   : > { %v2260_v12 = vpack.c.bf16 %v2232_v11, %v2230_v2 }
 0x542   : > { %v2261_v14 = vpack.c.bf16 %v2233_v28, %v2231_v22  ;;  %v2167_v16 = vpop.f32.mrb[40].mxu0 }
 0x543   : > { %v2168_v39 = vadd.f32 %v2167_v16, %v4221_v8  ;;  %v2169_v17 = vpop.f32.mrb[41].mxu0 }
 0x544   : > { %2449 = vmatprep.mubr.bf16.mxu1 %v2261_v14  ;;  %v2170_v34 = vadd.f32 %v2169_v17, %v4224_v33  ;;  %v2171_v57 = vpop.f32.mrb[42].mxu0 }
 0x545   : > { %2450 = vmatmul.mubr.bf16.gmra.mrb[36].mxu1 %v2260_v12  ;;  %v2172_v18 = vadd.f32 %v2171_v57, %v4221_v8  ;;  %v2173_v63 = vpop.f32.mrb[43].mxu0  ;;  %v2234_v20 = vmax.f32 %v2168_v39, 0.0 }
 0x546   : > { %v2174_v4 = vadd.f32 %v2173_v63, %v4224_v33  ;;  %v2235_v32 = vmax.f32 %v2170_v34, 0.0 }
 0x547   : > { %v2236_v21 = vmax.f32 %v2172_v18, 0.0 }
 0x548   : > { %v2237_v27 = vmax.f32 %v2174_v4, 0.0 }
 0x549   : > { %v2262_v5 = vpack.c.bf16 %v2236_v21, %v2234_v20 }
 0x54a   : > { %v2263_v26 = vpack.c.bf16 %v2237_v27, %v2235_v32  ;;  %v2177_v58 = vpop.f32.mrb[44].mxu0 }
 0x54b   : > { %v2178_v60 = vadd.f32 %v2177_v58, %v4221_v8  ;;  %v2179_v23 = vpop.f32.mrb[45].mxu0 }
 0x54c   : > { %v2180_v0 = vadd.f32 %v2179_v23, %v4224_v33  ;;  %v2181_v29 = vpop.f32.mrb[46].mxu0  ;;  %2457 = vmatprep.mubr.bf16.mxu1 %v2263_v26 }
 0x54d   : > { %v2182_v30 = vadd.f32 %v2181_v29, %v4221_v8  ;;  %v2183_v6 = vpop.f32.mrb[47].mxu0  ;;  %2458 = vmatmul.mubr.bf16.gmra.mrb[40].mxu1 %v2262_v5  ;;  %v2238_v31 = vmax.f32 %v2178_v60, 0.0 }
 0x54e   : > { %v2184_v42 = vadd.f32 %v2183_v6, %v4224_v33  ;;  %v2239_v1 = vmax.f32 %v2180_v0, 0.0 }
 0x54f   : > { %v2240_v10 = vmax.f32 %v2182_v30, 0.0 }
 0x550   : > { %v2241_v19 = vmax.f32 %v2184_v42, 0.0 }
 0x551   : > { %v2264_v35 = vpack.c.bf16 %v2240_v10, %v2238_v31  ;;  %v4261_v10 = vld [vmem:[%s4403_s0] ss:$0 sm:$0xff] }
 0x552   : > { %v2265_v38 = vpack.c.bf16 %v2241_v19, %v2239_v1  ;;  %v2187_v36 = vpop.f32.mrb[48].mxu0 }
 0x553   : > { %v2188_v37 = vadd.f32 %v2187_v36, %v4221_v8  ;;  %v2189_v40 = vpop.f32.mrb[49].mxu0 }
 0x554   : > { %v2190_v61 = vadd.f32 %v2189_v40, %v4224_v33  ;;  %v2191_v41 = vpop.f32.mrb[50].mxu0  ;;  %2465 = vmatprep.mubr.bf16.mxu1 %v2265_v38 }
 0x555   : > { %v2192_v25 = vadd.f32 %v2191_v41, %v4221_v8  ;;  %v2193_v47 = vpop.f32.mrb[51].mxu0  ;;  %2466 = vmatmul.mubr.bf16.gmra.mrb[44].mxu1 %v2264_v35  ;;  %v2242_v46 = vmax.f32 %v2188_v37, 0.0 }
 0x556   : > { %v2194_v56 = vadd.f32 %v2193_v47, %v4224_v33  ;;  %v2243_v45 = vmax.f32 %v2190_v61, 0.0 }
 0x557   : > { %v2244_v44 = vmax.f32 %v2192_v25, 0.0 }
 0x558   : > { %v2245_v13 = vmax.f32 %v2194_v56, 0.0 }
 0x559   : > { %v2266_v48 = vpack.c.bf16 %v2244_v44, %v2242_v46 }
 0x55a   : > { %v2267_v50 = vpack.c.bf16 %v2245_v13, %v2243_v45  ;;  %v2197_v53 = vpop.f32.mrb[52].mxu0 }
 0x55b   : > { %v2198_v52 = vadd.f32 %v2197_v53, %v4221_v8  ;;  %v2199_v55 = vpop.f32.mrb[53].mxu0 }
 0x55c   : > { %v2200_v51 = vadd.f32 %v2199_v55, %v4224_v33  ;;  %v2201_v7 = vpop.f32.mrb[54].mxu0  ;;  %2473 = vmatprep.mubr.bf16.mxu1 %v2267_v50 }
 0x55d   : > { %v2202_v24 = vadd.f32 %v2201_v7, %v4221_v8  ;;  %v2203_v54 = vpop.f32.mrb[55].mxu0  ;;  %2474 = vmatmul.mubr.bf16.gmra.mrb[48].mxu1 %v2266_v48  ;;  %v2246_v43 = vmax.f32 %v2198_v52, 0.0 }
 0x55e   : > { %v2204_v62 = vadd.f32 %v2203_v54, %v4224_v33  ;;  %v2247_v3 = vmax.f32 %v2200_v51, 0.0 }
 0x55f   : > { %v2248_v15 = vmax.f32 %v2202_v24, 0.0 }
 0x560   : > { %v2249_v49 = vmax.f32 %v2204_v62, 0.0 }
 0x561   : > { %v2268_v59 = vpack.c.bf16 %v2248_v15, %v2246_v43 }
 0x562   : > { %v2269_v9 = vpack.c.bf16 %v2249_v49, %v2247_v3  ;;  %v2207_v2 = vpop.f32.mrb[56].mxu0 }
 0x563   : > { %v2208_v11 = vadd.f32 %v2207_v2, %v4221_v8  ;;  %v2209_v22 = vpop.f32.mrb[57].mxu0 }
 0x564   : > { %v2210_v28 = vadd.f32 %v2209_v22, %v4224_v33  ;;  %v2211_v12 = vpop.f32.mrb[58].mxu0  ;;  %2481 = vmatprep.mubr.bf16.mxu1 %v2269_v9 }
 0x565   : > { %v2212_v14 = vadd.f32 %v2211_v12, %v4221_v8  ;;  %v2213_v16 = vpop.f32.mrb[59].mxu0  ;;  %2482 = vmatmul.mubr.bf16.gmra.mrb[52].mxu1 %v2268_v59  ;;  %v2250_v17 = vmax.f32 %v2208_v11, 0.0 }
 0x566   : > { %v2214_v39 = vadd.f32 %v2213_v16, %v4224_v33  ;;  %v2251_v57 = vmax.f32 %v2210_v28, 0.0 }
 0x567   : > { %v2252_v34 = vmax.f32 %v2212_v14, 0.0 }
 0x568   : > { %v2253_v18 = vmax.f32 %v2214_v39, 0.0 }
 0x569   : > { %v2270_v63 = vpack.c.bf16 %v2252_v34, %v2250_v17 }
 0x56a   : > { %v2271_v4 = vpack.c.bf16 %v2253_v18, %v2251_v57  ;;  %v2217_v20 = vpop.f32.mrb[60].mxu0 }
 0x56b   : > { %v2218_v21 = vadd.f32 %v2217_v20, %v4221_v8  ;;  %v2219_v32 = vpop.f32.mrb[61].mxu0 }
 0x56c   : > { %v2220_v27 = vadd.f32 %v2219_v32, %v4224_v33  ;;  %v2221_v5 = vpop.f32.mrb[62].mxu0  ;;  %2489 = vmatprep.mubr.bf16.mxu1 %v2271_v4 }
 0x56d   : > { %v2222_v26 = vadd.f32 %v2221_v5, %v4221_v8  ;;  %v2223_v58 = vpop.f32.mrb[63].mxu0  ;;  %2490 = vmatmul.mubr.bf16.gmra.mrb[56].mxu1 %v2270_v63  ;;  %v2254_v23 = vmax.f32 %v2218_v21, 0.0 }
 0x56e   : > { %v2224_v60 = vadd.f32 %v2223_v58, %v4224_v33  ;;  %v2255_v29 = vmax.f32 %v2220_v27, 0.0 }
 0x56f   : > { %v2256_v0 = vmax.f32 %v2222_v26, 0.0 }
 0x570   : > { %v2257_v30 = vmax.f32 %v2224_v60, 0.0 }
 0x571   : > { %v2272_v6 = vpack.c.bf16 %v2256_v0, %v2254_v23 }
 0x572   : > { %v2273_v42 = vpack.c.bf16 %v2257_v30, %v2255_v29 }
 0x574   : > { %2497 = vmatprep.mubr.bf16.mxu1 %v2273_v42 }
 0x575   : > { %2498 = vmatmul.mubr.bf16.gmra.mrb[60].mxu1 %v2272_v6 }
 0x608   : > { %v2803_v31 = vpop.f32.mrb[32].mxu1 }
 0x609   : > { %v2804_v8 = vpop.f32.mrb[33].mxu1 }
 0x60a   : > { %v2805_v1 = vadd.f32 %v2804_v8, %v2803_v31  ;;  %v2806_v19 = vpop.f32.mrb[34].mxu1 }
 0x60b   : > { %v2807_v35 = vpop.f32.mrb[35].mxu1 }
 0x60c   : > { %v2444_v33 = vadd.f32 %v2805_v1, %v4261_v10  ;;  %v2808_v38 = vadd.f32 %v2807_v35, %v2806_v19 }
 0x60e   : > { %2506 = vst [vmem:[%s4265_s29] sm:$0xff] %v2444_v33  ;;  %v2447_v36 = vadd.f32 %v2808_v38, %v4261_v10 }
 0x610   : > { %2507 = vst [vmem:[%s4265_s29 + $0x8] sm:$0xff] %v2447_v36 }
 0x618   : > { %v2809_v37 = vpop.f32.mrb[36].mxu1 }
 0x619   : > { %v2810_v40 = vpop.f32.mrb[37].mxu1 }
 0x61a   : > { %v2811_v61 = vadd.f32 %v2810_v40, %v2809_v37  ;;  %v2812_v41 = vpop.f32.mrb[38].mxu1 }
 0x61b   : > { %v2813_v25 = vpop.f32.mrb[39].mxu1 }
 0x61c   : > { %v2452_v47 = vadd.f32 %v2811_v61, %v4261_v10  ;;  %v2814_v56 = vadd.f32 %v2813_v25, %v2812_v41 }
 0x61e   : > { %2508 = vst [vmem:[%s4265_s29 + $0x10] sm:$0xff] %v2452_v47  ;;  %v2455_v46 = vadd.f32 %v2814_v56, %v4261_v10 }
 0x620   : > { %2509 = vst [vmem:[%s4265_s29 + $0x18] sm:$0xff] %v2455_v46  ;;  %v2815_v44 = vpop.f32.mrb[40].mxu1 }
 0x621   : > { %v2816_v45 = vpop.f32.mrb[41].mxu1 }
 0x622   : > { %v2817_v13 = vadd.f32 %v2816_v45, %v2815_v44  ;;  %v2818_v48 = vpop.f32.mrb[42].mxu1 }
 0x623   : > { %v2819_v50 = vpop.f32.mrb[43].mxu1 }
 0x624   : > { %v2460_v53 = vadd.f32 %v2817_v13, %v4261_v10  ;;  %v2820_v52 = vadd.f32 %v2819_v50, %v2818_v48 }
 0x626   : > { %2510 = vst [vmem:[%s4265_s29 + $0x20] sm:$0xff] %v2460_v53  ;;  %v2463_v55 = vadd.f32 %v2820_v52, %v4261_v10 }
 0x628   : > { %2511 = vst [vmem:[%s4265_s29 + $0x28] sm:$0xff] %v2463_v55  ;;  %v2821_v51 = vpop.f32.mrb[44].mxu1 }
 0x629   : > { %v2822_v7 = vpop.f32.mrb[45].mxu1 }
 0x62a   : > { %v2823_v24 = vadd.f32 %v2822_v7, %v2821_v51  ;;  %v2824_v54 = vpop.f32.mrb[46].mxu1 }
 0x62b   : > { %v2825_v62 = vpop.f32.mrb[47].mxu1 }
 0x62c   : > { %v2468_v43 = vadd.f32 %v2823_v24, %v4261_v10  ;;  %v2826_v15 = vadd.f32 %v2825_v62, %v2824_v54 }
 0x62e   : > { %2512 = vst [vmem:[%s4265_s29 + $0x30] sm:$0xff] %v2468_v43  ;;  %v2471_v3 = vadd.f32 %v2826_v15, %v4261_v10 }
 0x630   : > { %2513 = vst [vmem:[%s4265_s29 + $0x38] sm:$0xff] %v2471_v3  ;;  %v2827_v49 = vpop.f32.mrb[48].mxu1 }
 0x631   : > { %v2828_v59 = vpop.f32.mrb[49].mxu1 }
 0x632   : > { %v2829_v9 = vadd.f32 %v2828_v59, %v2827_v49  ;;  %v2830_v2 = vpop.f32.mrb[50].mxu1 }
 0x633   : > { %v2831_v11 = vpop.f32.mrb[51].mxu1 }
 0x634   : > { %v2476_v22 = vadd.f32 %v2829_v9, %v4261_v10  ;;  %v2832_v28 = vadd.f32 %v2831_v11, %v2830_v2 }
 0x636   : > { %2514 = vst [vmem:[%s4265_s29 + $0x40] sm:$0xff] %v2476_v22  ;;  %v2479_v12 = vadd.f32 %v2832_v28, %v4261_v10 }
 0x638   : > { %2515 = vst [vmem:[%s4265_s29 + $0x48] sm:$0xff] %v2479_v12  ;;  %v2833_v14 = vpop.f32.mrb[52].mxu1 }
 0x639   : > { %v2834_v16 = vpop.f32.mrb[53].mxu1 }
 0x63a   : > { %v2835_v39 = vadd.f32 %v2834_v16, %v2833_v14  ;;  %v2836_v17 = vpop.f32.mrb[54].mxu1 }
 0x63b   : > { %v2837_v34 = vpop.f32.mrb[55].mxu1 }
 0x63c   : > { %v2484_v57 = vadd.f32 %v2835_v39, %v4261_v10  ;;  %v2838_v18 = vadd.f32 %v2837_v34, %v2836_v17 }
 0x63e   : > { %2516 = vst [vmem:[%s4265_s29 + $0x50] sm:$0xff] %v2484_v57  ;;  %v2487_v63 = vadd.f32 %v2838_v18, %v4261_v10 }
 0x640   : > { %2517 = vst [vmem:[%s4265_s29 + $0x58] sm:$0xff] %v2487_v63  ;;  %v2839_v4 = vpop.f32.mrb[56].mxu1 }
 0x641   : > { %v2840_v20 = vpop.f32.mrb[57].mxu1 }
 0x642   : > { %v2841_v21 = vadd.f32 %v2840_v20, %v2839_v4  ;;  %v2842_v32 = vpop.f32.mrb[58].mxu1 }
 0x643   : > { %v2843_v27 = vpop.f32.mrb[59].mxu1 }
 0x644   : > { %v2492_v5 = vadd.f32 %v2841_v21, %v4261_v10  ;;  %v2844_v26 = vadd.f32 %v2843_v27, %v2842_v32 }
 0x646   : > { %2518 = vst [vmem:[%s4265_s29 + $0x60] sm:$0xff] %v2492_v5  ;;  %v2495_v58 = vadd.f32 %v2844_v26, %v4261_v10 }
 0x648   : > { %2519 = vst [vmem:[%s4265_s29 + $0x68] sm:$0xff] %v2495_v58  ;;  %v2845_v60 = vpop.f32.mrb[60].mxu1 }
 0x649   : > { %v2846_v23 = vpop.f32.mrb[61].mxu1 }
 0x64a   : > { %v2847_v0 = vadd.f32 %v2846_v23, %v2845_v60  ;;  %v2848_v29 = vpop.f32.mrb[62].mxu1 }
 0x64b   : > { %v2849_v30 = vpop.f32.mrb[63].mxu1 }
 0x64c   : > { %v2500_v6 = vadd.f32 %v2847_v0, %v4261_v10  ;;  %v2850_v42 = vadd.f32 %v2849_v30, %v2848_v29 }
 0x64e   : > { %2520 = vst [vmem:[%s4265_s29 + $0x70] sm:$0xff] %v2500_v6  ;;  %v2503_v31 = vadd.f32 %v2850_v42, %v4261_v10 }
 0x650   : > { %2521 = vst [vmem:[%s4265_s29 + $0x78] sm:$0xff] %v2503_v31 }
 0x651   : > { %3365 = shalt.err (!%p3362_p3)
}
 0x652   : > { %s3366_s15 = scalar_lea.hbm %s4300_s28, 2048  ;;  %s3370_s10 = scalar_lea.hbm %s4404_s8, 4096 }
 0x653   : > { %p3367_p9 = scmp.ne.s32.totalorder %s4300_s28, %s3366_s15  ;;  %p3371_p7 = scmp.lt.u32.totalorder %s4300_s28, %s4404_s8 }
 0x654   : > { %p3372_p12 = scmp.lt.u32.totalorder %s3370_s10, %s3366_s15  ;;  %p3374_p1 = scmp.lt.u32.totalorder %s3366_s15, %s4300_s28 }
 0x655   : > { %p3368_p13 = pnand %p3367_p9, %p3660_p5 }
 0x656   : > { %p3373_p2 = por %p3372_p12, %p3371_p7 }
 0x657   : > { %p3369_p11 = pneg %p3368_p13 }
 0x658   : > { %p3375_p4 = por %p3374_p1, %p3373_p2 }
 0x65a   : > { %p3376_p0 = pnand %p3375_p4, %p3369_p11 }
 0x65c   : > { %3379 = shalt.err (!%p3376_p0)
}
 0x65d   : > { %s3445_s27 = smov 128   ;;  %s3446_s0 = smov 8  }
 0x65e   : > { %2867 = dma.vmem_to_hbm [thread:$0]  (%p3660_p5), %s4302_s13, 2048, %s4300_s28, %s2523_s5, %s3445_s27, %s3445_s27, %s3446_s0  }
 0x65f PF: > { %s4405_s29 = sld [smem:[#allocation18_spill]]  ;;  %s4406_s17 = sld [smem:[#allocation20_spill]] }
 0x660   : > { %p4408_p6 = scmp.ge.s32.totalorder %s3430_s26, 2 }
 0x665   : > { %s2551_s30 = sand.u32 1, %s4405_s29   ;;  %p4407_p8 = scmp.ne.s32.totalorder %s4406_s17, 0 }
 0x666   : > { %s2552_s14 = scalar_lea.sflag [#allocation5], %s2551_s30 }
 0x667   : > { %p2887_p10 = pnand %p4408_p6, %p4407_p8 }
 0x669   : > { %3413 = dma.done.wait (!%p2887_p10), %s2552_s14, 2048  }
 0x66a   : > { %3415 = vsyncadd (!%p2887_p10), %s2552_s14, 4294965248  ;;  %s4409_s12 = sld [smem:[#allocation19_spill]]  ;;  %s4410_s25 = sld [smem:[#allocation21_spill]] }
 0x66b   : > { %p31_p3 = scmp.ge.s32.totalorder %s3646_s19, 4   ;;  %s4411_s23 = smov %s3422_s24 }
 0x66c   : > { %s4413_s26 = smov %s3646_s19 }
 0x66d   :  { %33 = sbr.rel (!%p31_p3) target bundleno = 15 (0xf), region = 138 }
 0x670   : > { %s4412_s24 = smov %s4409_s12 }
 0x674   :  { %2557 = vsyncpa [#allocation4], 1 }
 0x675   :  { %2559 = vsyncpa [#allocation4 + $0x1], 1 }
 0x676   :  { %2560 = vsyncpa [#allocation7], 1 }
 0x677   :  { %2562 = vsyncpa [#allocation7 + $0x1], 1 }
 0x678   :  { %2563 = vsyncpa [#allocation10], 1 }
 0x679   :  { %2564 = vsyncpa [#allocation5], 1 }
 0x67a   :  { %2566 = vsyncpa [#allocation5 + $0x1], 1 }

</bundles_post_ra>
